<compile_context>
chip_gen: v6e
topology: v6e:2x2x1
jax: 0.10.0
libtpu: 0.0.40
codegen_flags: <defaults>
</compile_context>

<pallas_src>
import functools

import jax
import jax.numpy as jnp
from jax import lax
from jax.experimental import pallas as pl
from jax.experimental.pallas import tpu as pltpu


def _round_up(v, m):
    return ((v + m - 1) // m) * m


def _temporal_block_kernel(x_ref, w1_ref, b1_ref, w2_ref, b2_ref, wd_ref, bd_ref,
                           out_ref, xpad, h1pad,
                           *, kernel_size, dilation, pad, pad_aligned, has_downsample):
    """One Bt-row block of a TemporalBlock, fully fused.

    x_ref   : (Bt, Wa, Cip)  bf16 channels-last rows (NOT pre-padded)
    w1_ref  : (k, Cip, Cop)  bf16 conv1 taps      b1_ref : (1, Cop) f32
    w2_ref  : (k, Cop, Cop)  bf16 conv2 taps      b2_ref : (1, Cop) f32
    wd_ref  : (Cip, Cop)     bf16 1x1 downsample  bd_ref : (1, Cop) f32 (unused if identity)
    out_ref : (Bt, Wa, Cop)  bf16
    xpad    : (Bt, Pa+Wa, Cip) bf16 VMEM scratch (causal left pad strip + staged x)
    h1pad   : (Bt, Pa+Wa, Cop) bf16 VMEM scratch (causal left pad strip + relu(conv1))
    """
    Bt, Wa, Cip = x_ref.shape
    Cop = out_ref.shape[2]
    k, d, P, Pa = kernel_size, dilation, pad, pad_aligned
    M = Bt * Wa

    x_val = x_ref[...]                                  # load once (taps + residual)

    # Causal left pad handled in VMEM (no HBM pre-pad).  Only the Pa pad rows are zeroed,
    # and they are zeroed every step (cheap) so results don't depend on scratch persistence
    # when the parallel grid axis is sharded across TensorCores (v7x megacore).
    if Pa > 0:
        xpad[:, :Pa, :] = jnp.zeros((Bt, Pa, Cip), xpad.dtype)
        h1pad[:, :Pa, :] = jnp.zeros((Bt, Pa, Cop), h1pad.dtype)
    xpad[:, Pa:, :] = x_val                             # Pa is 8-aligned -> aligned store

    # ---- conv1: k dilated causal taps, each an (M, Cip) @ (Cip, Cop) bf16 MXU matmul ----
    acc = jnp.zeros((M, Cop), jnp.float32)
    for t in range(k):
        s = Pa - P + t * d                              # static slice start
        lhs = xpad[:, s:s + Wa, :].reshape(M, Cip)
        acc = acc + jnp.dot(lhs, w1_ref[t], preferred_element_type=jnp.float32)
    h1 = jnp.maximum(acc + b1_ref[...], 0.0)            # f32 VPU work (v5e-friendly)
    h1pad[:, Pa:, :] = h1.reshape(Bt, Wa, Cop).astype(h1pad.dtype)

    # ---- conv2 ----
    acc = jnp.zeros((M, Cop), jnp.float32)
    for t in range(k):
        s = Pa - P + t * d
        lhs = h1pad[:, s:s + Wa, :].reshape(M, Cop)
        acc = acc + jnp.dot(lhs, w2_ref[t], preferred_element_type=jnp.float32)
    h2 = jnp.maximum(acc + b2_ref[...], 0.0)

    # ---- residual: 1x1 conv if n_inputs != n_outputs, else identity ----
    x2 = x_val.reshape(M, Cip)
    if has_downsample:
        res = jnp.dot(x2, wd_ref[...], preferred_element_type=jnp.float32) + bd_ref[...]
    else:
        res = x2.astype(jnp.float32)                    # Cip == Cop here
    out_ref[...] = jnp.maximum(h2 + res, 0.0).reshape(Bt, Wa, Cop).astype(out_ref.dtype)


def _temporal_block_pallas(x_bwc, w1, b1, w2, b2, wd, bd, *, kernel_size, dilation, block_b):
    """x_bwc: (Ba, Wa, Cip) bf16 padded channels-last rows.  Returns (Ba, Wa, Cop) bf16."""
    Ba, Wa, Cip = x_bwc.shape
    k = kernel_size
    Cop = w1.shape[2]
    P = (k - 1) * dilation
    Pa = _round_up(P, 8)                                # 8-aligned pad strip
    Bt = block_b
    has_downsample = wd is not None
    if not has_downsample:
        wd = jnp.zeros((Cip, Cop), jnp.bfloat16)        # placeholder, unused in kernel
        bd = jnp.zeros((1, Cop), jnp.float32)

    kernel = functools.partial(_temporal_block_kernel, kernel_size=k, dilation=dilation,
                               pad=P, pad_aligned=Pa, has_downsample=has_downsample)

    return pl.pallas_call(
        kernel,
        out_shape=jax.ShapeDtypeStruct((Ba, Wa, Cop), jnp.bfloat16),
        grid=(Ba // Bt,),
        in_specs=[
            pl.BlockSpec((Bt, Wa, Cip), lambda b: (b, 0, 0)),
            pl.BlockSpec((k, Cip, Cop), lambda b: (0, 0, 0)),   # constant index -> resident
            pl.BlockSpec((1, Cop), lambda b: (0, 0)),
            pl.BlockSpec((k, Cop, Cop), lambda b: (0, 0, 0)),
            pl.BlockSpec((1, Cop), lambda b: (0, 0)),
            pl.BlockSpec((Cip, Cop), lambda b: (0, 0)),
            pl.BlockSpec((1, Cop), lambda b: (0, 0)),
        ],
        out_specs=pl.BlockSpec((Bt, Wa, Cop), lambda b: (b, 0, 0)),
        scratch_shapes=[pltpu.VMEM((Bt, Pa + Wa, Cip), jnp.bfloat16),
                        pltpu.VMEM((Bt, Pa + Wa, Cop), jnp.bfloat16)],
        compiler_params=pltpu.CompilerParams(dimension_semantics=("parallel",)),
    )(x_bwc, w1, b1, w2, b2, wd, bd)


def _choose_block_b(B, Wa):
    """Rows per grid step: aim for an MXU M-dim (Bt*Wa) >= 512, stay far below v7x VMEM."""
    bt = _round_up(max(1, -(-512 // Wa)), 8)
    cap = (2 * 1024 * 1024) // (Wa * 128 * 2)           # ~2 MiB bf16 per 128-lane slab
    cap = max(8, (cap // 8) * 8)
    bt = max(8, min(bt, cap))
    return min(bt, _round_up(B, 8))


def temporal_conv_net_pallas(x, params):
    """x: [N, Cin, H, W] f32.  params: per-level dicts with PyTorch-layout weights
    w1 (Cout,Cin,1,k), b1 (Cout,), w2 (Cout,Cout,1,k), b2 (Cout,),
    wd (Cout,Cin,1,1) or None, bd (Cout,) or None, dilation.  Returns [N, Clast, H, W] f32."""
    N, Cin, H, W = x.shape
    B = N * H
    Wa = _round_up(W, 8)
    Bt = _choose_block_b(B, Wa)
    Ba = _round_up(B, Bt)

    # One-time layout change: NCHW -> channels-last rows, right-pad W, pad rows, pad
    # channels to the 128-lane width, cast bf16.  Kept padded/bf16 through all layers.
    x_bwc = jnp.transpose(x, (0, 2, 3, 1)).reshape(B, W, Cin)
    Cip = _round_up(Cin, 128)
    h = jnp.zeros((Ba, Wa, Cip), jnp.bfloat16).at[:B, :W, :Cin].set(x_bwc.astype(jnp.bfloat16))

    c_in = Cin
    for lp in params:
        c_out = lp["w1"].shape[0]
        k = lp["w1"].shape[3]
        Cip = h.shape[2]
        Cop = _round_up(c_out, 128)
        # OIHW taps -> (k, Cin, Cout), zero-padded to lane width, bf16.
        w1 = jnp.zeros((k, Cip, Cop), jnp.bfloat16).at[:, :c_in, :c_out].set(
            jnp.transpose(lp["w1"][:, :, 0, :], (2, 1, 0)).astype(jnp.bfloat16))
        w2 = jnp.zeros((k, Cop, Cop), jnp.bfloat16).at[:, :c_out, :c_out].set(
            jnp.transpose(lp["w2"][:, :, 0, :], (2, 1, 0)).astype(jnp.bfloat16))
        b1 = jnp.zeros((1, Cop), jnp.float32).at[0, :c_out].set(lp["b1"])
        b2 = jnp.zeros((1, Cop), jnp.float32).at[0, :c_out].set(lp["b2"])
        if lp["wd"] is not None:
            wd = jnp.zeros((Cip, Cop), jnp.bfloat16).at[:c_in, :c_out].set(
                jnp.transpose(lp["wd"][:, :, 0, 0], (1, 0)).astype(jnp.bfloat16))
            bd = jnp.zeros((1, Cop), jnp.float32).at[0, :c_out].set(lp["bd"])
        else:
            wd, bd = None, None
        h = _temporal_block_pallas(h, w1, b1, w2, b2, wd, bd,
                                   kernel_size=k, dilation=lp["dilation"], block_b=Bt)
        c_in = c_out

    out = h[:B, :W, :c_in].astype(jnp.float32)
    return jnp.transpose(out.reshape(N, H, W, c_in), (0, 3, 1, 2))


# ---------------- pure-JAX f32 reference (mirrors the PyTorch forward) ----------------
def _temporal_block_ref(x, w1, b1, w2, b2, wd, bd, *, dilation, padding):
    dn = ("NCHW", "OIHW", "NCHW")
    pad_w = ((0, 0), (0, 0), (0, 0), (padding, 0))
    y1 = lax.conv_general_dilated(jnp.pad(x, pad_w), w1, (1, 1), "VALID",
                                  rhs_dilation=(1, dilation), dimension_numbers=dn)
    y1 = jax.nn.relu(y1 + b1[None, :, None, None])
    y2 = lax.conv_general_dilated(jnp.pad(y1, pad_w), w2, (1, 1), "VALID",
                                  rhs_dilation=(1, dilation), dimension_numbers=dn)
    y2 = jax.nn.relu(y2 + b2[None, :, None, None])
    if wd is None:
        res = x
    else:
        res = lax.conv_general_dilated(x, wd, (1, 1), "VALID",
                                       dimension_numbers=dn) + bd[None, :, None, None]
    return jax.nn.relu(y2 + res)


def temporal_conv_net_ref(x, params):
    h = x
    for lp in params:
        k = lp["w1"].shape[3]
        h = _temporal_block_ref(h, lp["w1"], lp["b1"], lp["w2"], lp["b2"], lp["wd"], lp["bd"],
                                dilation=lp["dilation"], padding=(k - 1) * lp["dilation"])
    return h


if __name__ == "__main__":
    # TemporalConvNet(num_inputs=4, num_channels=[8, 8, 6], kernel_size=3)
    num_inputs = 4
    num_channels = [8, 8, 6]          # level 1 has in == out -> identity residual path
    kernel_size = 3
    N, H, W = 2, 3, 16

    key = jax.random.PRNGKey(0)
    k_x, key = jax.random.split(key)
    x = jax.random.normal(k_x, (N, num_inputs, H, W), jnp.float32)

    params = []
    c_in = num_inputs
    for i, c_out in enumerate(num_channels):
        d = 2 ** i
        ks = jax.random.split(jax.random.fold_in(key, i), 6)
        w1 = 0.01 * jax.random.normal(ks[0], (c_out, c_in, 1, kernel_size), jnp.float32)
        b1 = 0.05 * jax.random.normal(ks[1], (c_out,), jnp.float32)
        w2 = 0.01 * jax.random.normal(ks[2], (c_out, c_out, 1, kernel_size), jnp.float32)
        b2 = 0.05 * jax.random.normal(ks[3], (c_out,), jnp.float32)
        if c_in != c_out:
            wd = 0.01 * jax.random.normal(ks[4], (c_out, c_in, 1, 1), jnp.float32)
            bd = 0.05 * jax.random.normal(ks[5], (c_out,), jnp.float32)
        else:
            wd, bd = None, None
        params.append(dict(w1=w1, b1=b1, w2=w2, b2=b2, wd=wd, bd=bd, dilation=d))
        c_in = c_out

    out = temporal_conv_net_pallas(x, params)
    out = jax.block_until_ready(out)
    ref = temporal_conv_net_ref(x, params)

    assert out.shape == (N, num_channels[-1], H, W), out.shape
    max_err = float(jnp.max(jnp.abs(out - ref)))
    assert jnp.allclose(out, ref, atol=2e-2, rtol=2e-2), max_err   # bf16 MXU tolerance
    print("KERNEL_OK")
</pallas_src>

<mosaic_0001>
module attributes {stable_mosaic.version = 11 : i64} {
  func.func @_temporal_block_kernel(%arg0: i32, %arg1: memref<8x16x128xbf16, #tpu.memory_space<vmem>>, %arg2: memref<3x128x128xbf16, #tpu.memory_space<vmem>>, %arg3: memref<1x128xf32, #tpu.memory_space<vmem>>, %arg4: memref<3x128x128xbf16, #tpu.memory_space<vmem>>, %arg5: memref<1x128xf32, #tpu.memory_space<vmem>>, %arg6: memref<128x128xbf16, #tpu.memory_space<vmem>>, %arg7: memref<1x128xf32, #tpu.memory_space<vmem>>, %arg8: memref<8x16x128xbf16, #tpu.memory_space<vmem>>, %arg9: memref<8x24x128xbf16, #tpu.memory_space<vmem>>, %arg10: memref<8x24x128xbf16, #tpu.memory_space<vmem>>) attributes {dimension_semantics = [#tpu.dimension_semantics<parallel>], iteration_bounds = array<i64: 1>, scalar_prefetch = 0 : i64, scratch_operands = 2 : i64, tpu.core_type = #tpu.core_type<tc>, window_params = [{transform_indices = @transform_0, window_bounds = array<i64: 8, 16, 128>}, {pipeline_mode = #tpu.pipeline_mode<synchronous>, transform_indices = @transform_1, window_bounds = array<i64: 3, 128, 128>}, {pipeline_mode = #tpu.pipeline_mode<synchronous>, transform_indices = @transform_2, window_bounds = array<i64: 1, 128>}, {pipeline_mode = #tpu.pipeline_mode<synchronous>, transform_indices = @transform_3, window_bounds = array<i64: 3, 128, 128>}, {pipeline_mode = #tpu.pipeline_mode<synchronous>, transform_indices = @transform_4, window_bounds = array<i64: 1, 128>}, {pipeline_mode = #tpu.pipeline_mode<synchronous>, transform_indices = @transform_5, window_bounds = array<i64: 128, 128>}, {pipeline_mode = #tpu.pipeline_mode<synchronous>, transform_indices = @transform_6, window_bounds = array<i64: 1, 128>}, {transform_indices = @transform_7, window_bounds = array<i64: 8, 16, 128>}]} {
    %c0 = arith.constant 0 : index
    %c0_0 = arith.constant 0 : index
    %c0_1 = arith.constant 0 : index
    %0 = vector.load %arg1[%c0, %c0_0, %c0_1] : memref<8x16x128xbf16, #tpu.memory_space<vmem>>, vector<8x16x128xbf16>
    %cst = arith.constant 0.000000e+00 : bf16
    %1 = vector.broadcast %cst : bf16 to vector<8x8x128xbf16>
    %c0_2 = arith.constant 0 : index
    %c0_3 = arith.constant 0 : index
    %c0_4 = arith.constant 0 : index
    %2 = vector.load %arg9[%c0_2, %c0_3, %c0_4] : memref<8x24x128xbf16, #tpu.memory_space<vmem>>, vector<8x8x128xbf16>
    tpu.vector_store %arg9[%c0_2, %c0_3, %c0_4], %1 {strides = array<i32>} : memref<8x24x128xbf16, #tpu.memory_space<vmem>>, vector<8x8x128xbf16>,
    %cst_5 = arith.constant 0.000000e+00 : bf16
    %3 = vector.broadcast %cst_5 : bf16 to vector<8x8x128xbf16>
    %c0_6 = arith.constant 0 : index
    %c0_7 = arith.constant 0 : index
    %c0_8 = arith.constant 0 : index
    %4 = vector.load %arg10[%c0_6, %c0_7, %c0_8] : memref<8x24x128xbf16, #tpu.memory_space<vmem>>, vector<8x8x128xbf16>
    tpu.vector_store %arg10[%c0_6, %c0_7, %c0_8], %3 {strides = array<i32>} : memref<8x24x128xbf16, #tpu.memory_space<vmem>>, vector<8x8x128xbf16>,
    %c0_9 = arith.constant 0 : index
    %c8 = arith.constant 8 : index
    %c0_10 = arith.constant 0 : index
    %5 = vector.load %arg9[%c0_9, %c8, %c0_10] : memref<8x24x128xbf16, #tpu.memory_space<vmem>>, vector<8x16x128xbf16>
    tpu.vector_store %arg9[%c0_9, %c8, %c0_10], %0 {strides = array<i32>} : memref<8x24x128xbf16, #tpu.memory_space<vmem>>, vector<8x16x128xbf16>,
    %cst_11 = arith.constant 0.000000e+00 : f32
    %6 = vector.broadcast %cst_11 : f32 to vector<128x128xf32>
    %c0_12 = arith.constant 0 : index
    %c6 = arith.constant 6 : index
    %c0_13 = arith.constant 0 : index
    %7 = vector.load %arg9[%c0_12, %c6, %c0_13] : memref<8x24x128xbf16, #tpu.memory_space<vmem>>, vector<8x16x128xbf16>
    %8 = vector.shape_cast %7 : vector<8x16x128xbf16> to vector<128x128xbf16>
    %c0_14 = arith.constant 0 : index
    %c0_15 = arith.constant 0 : index
    %c0_16 = arith.constant 0 : index
    %9 = vector.load %arg2[%c0_14, %c0_15, %c0_16] : memref<3x128x128xbf16, #tpu.memory_space<vmem>>, vector<1x128x128xbf16>
    %10 = vector.shape_cast %9 : vector<1x128x128xbf16> to vector<128x128xbf16>
    %cst_17 = arith.constant dense<0.000000e+00> : vector<128x128xf32>
    %11 = tpu.matmul %8, %10, %cst_17 {dimension_numbers = #tpu.dot_dimension_numbers<[1], [0], [0], [1], [0, 0, 1, 1], [], []>} : vector<128x128xbf16>, vector<128x128xbf16>, vector<128x128xf32> -> vector<128x128xf32>
    %12 = arith.addf %6, %11 : vector<128x128xf32>
    %c0_18 = arith.constant 0 : index
    %c7 = arith.constant 7 : index
    %c0_19 = arith.constant 0 : index
    %13 = vector.load %arg9[%c0_18, %c7, %c0_19] : memref<8x24x128xbf16, #tpu.memory_space<vmem>>, vector<8x16x128xbf16>
    %14 = vector.shape_cast %13 : vector<8x16x128xbf16> to vector<128x128xbf16>
    %c1 = arith.constant 1 : index
    %c0_20 = arith.constant 0 : index
    %c0_21 = arith.constant 0 : index
    %15 = vector.load %arg2[%c1, %c0_20, %c0_21] : memref<3x128x128xbf16, #tpu.memory_space<vmem>>, vector<1x128x128xbf16>
    %16 = vector.shape_cast %15 : vector<1x128x128xbf16> to vector<128x128xbf16>
    %cst_22 = arith.constant dense<0.000000e+00> : vector<128x128xf32>
    %17 = tpu.matmul %14, %16, %cst_22 {dimension_numbers = #tpu.dot_dimension_numbers<[1], [0], [0], [1], [0, 0, 1, 1], [], []>} : vector<128x128xbf16>, vector<128x128xbf16>, vector<128x128xf32> -> vector<128x128xf32>
    %18 = arith.addf %12, %17 : vector<128x128xf32>
    %c0_23 = arith.constant 0 : index
    %c8_24 = arith.constant 8 : index
    %c0_25 = arith.constant 0 : index
    %19 = vector.load %arg9[%c0_23, %c8_24, %c0_25] : memref<8x24x128xbf16, #tpu.memory_space<vmem>>, vector<8x16x128xbf16>
    %20 = vector.shape_cast %19 : vector<8x16x128xbf16> to vector<128x128xbf16>
    %c2 = arith.constant 2 : index
    %c0_26 = arith.constant 0 : index
    %c0_27 = arith.constant 0 : index
    %21 = vector.load %arg2[%c2, %c0_26, %c0_27] : memref<3x128x128xbf16, #tpu.memory_space<vmem>>, vector<1x128x128xbf16>
    %22 = vector.shape_cast %21 : vector<1x128x128xbf16> to vector<128x128xbf16>
    %cst_28 = arith.constant dense<0.000000e+00> : vector<128x128xf32>
    %23 = tpu.matmul %20, %22, %cst_28 {dimension_numbers = #tpu.dot_dimension_numbers<[1], [0], [0], [1], [0, 0, 1, 1], [], []>} : vector<128x128xbf16>, vector<128x128xbf16>, vector<128x128xf32> -> vector<128x128xf32>
    %24 = arith.addf %18, %23 : vector<128x128xf32>
    %c0_29 = arith.constant 0 : index
    %c0_30 = arith.constant 0 : index
    %25 = vector.load %arg3[%c0_29, %c0_30] : memref<1x128xf32, #tpu.memory_space<vmem>>, vector<1x128xf32>
    %26 = vector.broadcast %25 : vector<1x128xf32> to vector<128x128xf32>
    %27 = arith.addf %24, %26 : vector<128x128xf32>
    %cst_31 = arith.constant 0.000000e+00 : f32
    %28 = vector.broadcast %cst_31 : f32 to vector<128x128xf32>
    %29 = arith.maximumf %27, %28 : vector<128x128xf32>
    %30 = vector.shape_cast %29 : vector<128x128xf32> to vector<8x16x128xf32>
    %31 = arith.truncf %30 : vector<8x16x128xf32> to vector<8x16x128xbf16>
    %c0_32 = arith.constant 0 : index
    %c8_33 = arith.constant 8 : index
    %c0_34 = arith.constant 0 : index
    %32 = vector.load %arg10[%c0_32, %c8_33, %c0_34] : memref<8x24x128xbf16, #tpu.memory_space<vmem>>, vector<8x16x128xbf16>
    tpu.vector_store %arg10[%c0_32, %c8_33, %c0_34], %31 {strides = array<i32>} : memref<8x24x128xbf16, #tpu.memory_space<vmem>>, vector<8x16x128xbf16>,
    %cst_35 = arith.constant 0.000000e+00 : f32
    %33 = vector.broadcast %cst_35 : f32 to vector<128x128xf32>
    %c0_36 = arith.constant 0 : index
    %c6_37 = arith.constant 6 : index
    %c0_38 = arith.constant 0 : index
    %34 = vector.load %arg10[%c0_36, %c6_37, %c0_38] : memref<8x24x128xbf16, #tpu.memory_space<vmem>>, vector<8x16x128xbf16>
    %35 = vector.shape_cast %34 : vector<8x16x128xbf16> to vector<128x128xbf16>
    %c0_39 = arith.constant 0 : index
    %c0_40 = arith.constant 0 : index
    %c0_41 = arith.constant 0 : index
    %36 = vector.load %arg4[%c0_39, %c0_40, %c0_41] : memref<3x128x128xbf16, #tpu.memory_space<vmem>>, vector<1x128x128xbf16>
    %37 = vector.shape_cast %36 : vector<1x128x128xbf16> to vector<128x128xbf16>
    %cst_42 = arith.constant dense<0.000000e+00> : vector<128x128xf32>
    %38 = tpu.matmul %35, %37, %cst_42 {dimension_numbers = #tpu.dot_dimension_numbers<[1], [0], [0], [1], [0, 0, 1, 1], [], []>} : vector<128x128xbf16>, vector<128x128xbf16>, vector<128x128xf32> -> vector<128x128xf32>
    %39 = arith.addf %33, %38 : vector<128x128xf32>
    %c0_43 = arith.constant 0 : index
    %c7_44 = arith.constant 7 : index
    %c0_45 = arith.constant 0 : index
    %40 = vector.load %arg10[%c0_43, %c7_44, %c0_45] : memref<8x24x128xbf16, #tpu.memory_space<vmem>>, vector<8x16x128xbf16>
    %41 = vector.shape_cast %40 : vector<8x16x128xbf16> to vector<128x128xbf16>
    %c1_46 = arith.constant 1 : index
    %c0_47 = arith.constant 0 : index
    %c0_48 = arith.constant 0 : index
    %42 = vector.load %arg4[%c1_46, %c0_47, %c0_48] : memref<3x128x128xbf16, #tpu.memory_space<vmem>>, vector<1x128x128xbf16>
    %43 = vector.shape_cast %42 : vector<1x128x128xbf16> to vector<128x128xbf16>
    %cst_49 = arith.constant dense<0.000000e+00> : vector<128x128xf32>
    %44 = tpu.matmul %41, %43, %cst_49 {dimension_numbers = #tpu.dot_dimension_numbers<[1], [0], [0], [1], [0, 0, 1, 1], [], []>} : vector<128x128xbf16>, vector<128x128xbf16>, vector<128x128xf32> -> vector<128x128xf32>
    %45 = arith.addf %39, %44 : vector<128x128xf32>
    %c0_50 = arith.constant 0 : index
    %c8_51 = arith.constant 8 : index
    %c0_52 = arith.constant 0 : index
    %46 = vector.load %arg10[%c0_50, %c8_51, %c0_52] : memref<8x24x128xbf16, #tpu.memory_space<vmem>>, vector<8x16x128xbf16>
    %47 = vector.shape_cast %46 : vector<8x16x128xbf16> to vector<128x128xbf16>
    %c2_53 = arith.constant 2 : index
    %c0_54 = arith.constant 0 : index
    %c0_55 = arith.constant 0 : index
    %48 = vector.load %arg4[%c2_53, %c0_54, %c0_55] : memref<3x128x128xbf16, #tpu.memory_space<vmem>>, vector<1x128x128xbf16>
    %49 = vector.shape_cast %48 : vector<1x128x128xbf16> to vector<128x128xbf16>
    %cst_56 = arith.constant dense<0.000000e+00> : vector<128x128xf32>
    %50 = tpu.matmul %47, %49, %cst_56 {dimension_numbers = #tpu.dot_dimension_numbers<[1], [0], [0], [1], [0, 0, 1, 1], [], []>} : vector<128x128xbf16>, vector<128x128xbf16>, vector<128x128xf32> -> vector<128x128xf32>
    %51 = arith.addf %45, %50 : vector<128x128xf32>
    %c0_57 = arith.constant 0 : index
    %c0_58 = arith.constant 0 : index
    %52 = vector.load %arg5[%c0_57, %c0_58] : memref<1x128xf32, #tpu.memory_space<vmem>>, vector<1x128xf32>
    %53 = vector.broadcast %52 : vector<1x128xf32> to vector<128x128xf32>
    %54 = arith.addf %51, %53 : vector<128x128xf32>
    %cst_59 = arith.constant 0.000000e+00 : f32
    %55 = vector.broadcast %cst_59 : f32 to vector<128x128xf32>
    %56 = arith.maximumf %54, %55 : vector<128x128xf32>
    %57 = vector.shape_cast %0 : vector<8x16x128xbf16> to vector<128x128xbf16>
    %c0_60 = arith.constant 0 : index
    %c0_61 = arith.constant 0 : index
    %58 = vector.load %arg6[%c0_60, %c0_61] : memref<128x128xbf16, #tpu.memory_space<vmem>>, vector<128x128xbf16>
    %cst_62 = arith.constant dense<0.000000e+00> : vector<128x128xf32>
    %59 = tpu.matmul %57, %58, %cst_62 {dimension_numbers = #tpu.dot_dimension_numbers<[1], [0], [0], [1], [0, 0, 1, 1], [], []>} : vector<128x128xbf16>, vector<128x128xbf16>, vector<128x128xf32> -> vector<128x128xf32>
    %c0_63 = arith.constant 0 : index
    %c0_64 = arith.constant 0 : index
    %60 = vector.load %arg7[%c0_63, %c0_64] : memref<1x128xf32, #tpu.memory_space<vmem>>, vector<1x128xf32>
    %61 = vector.broadcast %60 : vector<1x128xf32> to vector<128x128xf32>
    %62 = arith.addf %59, %61 : vector<128x128xf32>
    %63 = arith.addf %56, %62 : vector<128x128xf32>
    %cst_65 = arith.constant 0.000000e+00 : f32
    %64 = vector.broadcast %cst_65 : f32 to vector<128x128xf32>
    %65 = arith.maximumf %63, %64 : vector<128x128xf32>
    %66 = vector.shape_cast %65 : vector<128x128xf32> to vector<8x16x128xf32>
    %67 = arith.truncf %66 : vector<8x16x128xf32> to vector<8x16x128xbf16>
    %c0_66 = arith.constant 0 : index
    %c0_67 = arith.constant 0 : index
    %c0_68 = arith.constant 0 : index
    %68 = vector.load %arg8[%c0_66, %c0_67, %c0_68] : memref<8x16x128xbf16, #tpu.memory_space<vmem>>, vector<8x16x128xbf16>
    tpu.vector_store %arg8[%c0_66, %c0_67, %c0_68], %67 {strides = array<i32>} : memref<8x16x128xbf16, #tpu.memory_space<vmem>>, vector<8x16x128xbf16>,
    return
  }
  func.func @transform_0(%arg0: i32) -> (i32, i32, i32) {
    %c0_i32 = arith.constant 0 : i32
    %c0_i32_0 = arith.constant 0 : i32
    %c0_i32_1 = arith.constant 0 : i32
    return %arg0, %c0_i32, %c0_i32_0 : i32, i32, i32
  }
  func.func @transform_1(%arg0: i32) -> (i32, i32, i32) {
    %c0_i32 = arith.constant 0 : i32
    %c0_i32_0 = arith.constant 0 : i32
    %c0_i32_1 = arith.constant 0 : i32
    %c0_i32_2 = arith.constant 0 : i32
    return %c0_i32, %c0_i32_0, %c0_i32_1 : i32, i32, i32
  }
  func.func @transform_2(%arg0: i32) -> (i32, i32) {
    %c0_i32 = arith.constant 0 : i32
    %c0_i32_0 = arith.constant 0 : i32
    %c0_i32_1 = arith.constant 0 : i32
    return %c0_i32, %c0_i32_0 : i32, i32
  }
  func.func @transform_3(%arg0: i32) -> (i32, i32, i32) {
    %c0_i32 = arith.constant 0 : i32
    %c0_i32_0 = arith.constant 0 : i32
    %c0_i32_1 = arith.constant 0 : i32
    %c0_i32_2 = arith.constant 0 : i32
    return %c0_i32, %c0_i32_0, %c0_i32_1 : i32, i32, i32
  }
  func.func @transform_4(%arg0: i32) -> (i32, i32) {
    %c0_i32 = arith.constant 0 : i32
    %c0_i32_0 = arith.constant 0 : i32
    %c0_i32_1 = arith.constant 0 : i32
    return %c0_i32, %c0_i32_0 : i32, i32
  }
  func.func @transform_5(%arg0: i32) -> (i32, i32) {
    %c0_i32 = arith.constant 0 : i32
    %c0_i32_0 = arith.constant 0 : i32
    %c0_i32_1 = arith.constant 0 : i32
    return %c0_i32, %c0_i32_0 : i32, i32
  }
  func.func @transform_6(%arg0: i32) -> (i32, i32) {
    %c0_i32 = arith.constant 0 : i32
    %c0_i32_0 = arith.constant 0 : i32
    %c0_i32_1 = arith.constant 0 : i32
    return %c0_i32, %c0_i32_0 : i32, i32
  }
  func.func @transform_7(%arg0: i32) -> (i32, i32, i32) {
    %c0_i32 = arith.constant 0 : i32
    %c0_i32_0 = arith.constant 0 : i32
    %c0_i32_1 = arith.constant 0 : i32
    return %arg0, %c0_i32, %c0_i32_0 : i32, i32, i32
  }
}

</mosaic_0001>

<bundles_post_ra>
// kernel: tpu_custom_call.1
= control target key start
LH: loop header
LB: loop body
LE: loop exit
PB: predicated region body
PF: predicated region fallthrough
CT: control target
= control target key end

     0   :  { %12 = vsyncpa [#allocation5], 0  ;;  %s4039_s0 = inlined_call_operand.hbm [shape: bf16[8,16,128], index: 0, kind: input, shape index: {}]   ;;  %s4040_s1 = inlined_call_operand.hbm [shape: bf16[3,128,128], index: 1, kind: input, shape index: {}]   ;;  %s4041_s2 = inlined_call_operand.vmem [shape: f32[1,128], index: 2, kind: input, shape index: {}]   ;;  %s4042_s3 = inlined_call_operand.hbm [shape: bf16[3,128,128], index: 3, kind: input, shape index: {}]   ;;  %s4043_s4 = inlined_call_operand.vmem [shape: f32[1,128], index: 4, kind: input, shape index: {}]   ;;  %s4044_s5 = inlined_call_operand.hbm [shape: bf16[128,128], index: 5, kind: input, shape index: {}]   ;;  %s4045_s6 = inlined_call_operand.vmem [shape: f32[1,128], index: 6, kind: input, shape index: {}]   ;;  %s4046_s7 = inlined_call_operand.hbm [shape: bf16[8,16,128], index: 7, kind: output, shape index: {}]  }
   0x1   :  { %13 = vsyncpa [#allocation8], 0 }
   0x2   :  { %14 = vsyncpa [#allocation11], 0 }
   0x3   :  { %15 = vsyncpa [#allocation6], 0  ;;  %s3257_s24 = smov [#allocation7]   ;;  %s3258_s26 = smov [#allocation4]  }
   0x4   :  { %s33_s25 = sshll.u32 %s3257_s24, 4  ;;  %s21_s27 = sshll.u32 %s3258_s26, 4  ;;  %s34_s25 = int_to_ptr.vmem [resolvable:$true] %s33_s25  ;;  %s22_s27 = int_to_ptr.vmem [resolvable:$true] %s21_s27 }
   0x5   :  { %s3157_s28 = scalar_lea.vmem %s34_s25, 3072  ;;  %p3162_p1 = scmp.lt.s32.totalorder %s34_s25, %s34_s25 }
   0x6   :  { %p3158_p0 = scmp.ne.s32.totalorder %s34_s25, %s3157_s28  ;;  %p3163_p2 = scmp.lt.s32.totalorder %s3157_s28, %s3157_s28 }
   0x8   :  { %p3164_p3 = por %p3163_p2, %p3162_p1 }
   0xa   :  { %p3165_p4 = pnand %p3164_p3, %p3158_p0 }
   0xc   :  { %3168 = shalt.err (!%p3165_p4)
}
   0xd   :  { %s3259_s29 = smov 64   ;;  %s3260_s30 = smov 4  }
   0xe   :  { %39 = dma.hbm_to_vmem [thread:$0]  %s4040_s1, 3072, %s34_s25, [#allocation8], %s3259_s29, %s3259_s29, %s3260_s30  }
   0xf   :  { %s3177_s10 = scalar_lea.vmem %s22_s27, 1024  ;;  %p3182_p6 = scmp.lt.s32.totalorder %s22_s27, %s22_s27 }
  0x10   :  { %p3178_p5 = scmp.ne.s32.totalorder %s22_s27, %s3177_s10  ;;  %p3183_p7 = scmp.lt.s32.totalorder %s3177_s10, %s3177_s10 }
  0x12   :  { %p3184_p8 = por %p3183_p7, %p3182_p6 }
  0x14   :  { %p3185_p9 = pnand %p3184_p8, %p3178_p5 }
  0x16   :  { %3188 = shalt.err (!%p3185_p9)
}
  0x17   :  { %27 = dma.hbm_to_vmem [thread:$0]  %s4039_s0, 1024, %s22_s27, [#allocation5], %s3259_s29, %s3259_s29, %s3260_s30  }
  0x18   :  { %s3261_s13 = smov [#allocation9]   ;;  %s3262_s15 = smov [#allocation10]  }
  0x19   :  { %s47_s14 = sshll.u32 %s3261_s13, 4  ;;  %s61_s16 = sshll.u32 %s3262_s15, 4  ;;  %s48_s14 = int_to_ptr.vmem [resolvable:$true] %s47_s14  ;;  %s62_s16 = int_to_ptr.vmem [resolvable:$true] %s61_s16 }
  0x1a   :  { %s3197_s1 = scalar_lea.vmem %s48_s14, 3072  ;;  %p3202_p11 = scmp.lt.s32.totalorder %s48_s14, %s48_s14 }
  0x1b   :  { %p3198_p10 = scmp.ne.s32.totalorder %s48_s14, %s3197_s1  ;;  %p3203_p12 = scmp.lt.s32.totalorder %s3197_s1, %s3197_s1 }
  0x1d   :  { %p3204_p13 = por %p3203_p12, %p3202_p11 }
  0x1f   :  { %p3205_p0 = pnand %p3204_p13, %p3198_p10 }
  0x21   :  { %3208 = shalt.err (!%p3205_p0)
}
  0x22   :  { %53 = dma.hbm_to_vmem [thread:$0]  %s4042_s3, 3072, %s48_s14, [#allocation8], %s3259_s29, %s3259_s29, %s3260_s30  }
  0x23   :  { %s3217_s0 = scalar_lea.vmem %s62_s16, 1024  ;;  %p3222_p2 = scmp.lt.s32.totalorder %s62_s16, %s62_s16 }
  0x24   :  { %p3218_p1 = scmp.ne.s32.totalorder %s62_s16, %s3217_s0  ;;  %p3223_p3 = scmp.lt.s32.totalorder %s3217_s0, %s3217_s0 }
  0x26   :  { %p3224_p4 = por %p3223_p3, %p3222_p2 }
  0x28   :  { %p3225_p5 = pnand %p3224_p4, %p3218_p1 }
  0x2a   :  { %3228 = shalt.err (!%p3225_p5)
}
  0x2b   :  { %67 = dma.hbm_to_vmem [thread:$0]  %s4044_s5, 1024, %s62_s16, [#allocation11], %s3259_s29, %s3259_s29, %s3260_s30  }
  0x2c   :  { %3249 = dma.done.wait [#allocation5], 1024  }
  0x2d   :  { %3250 = vsyncadd [#allocation5], 4294966272 }
  0x2e   :  { %3251 = dma.done.wait [#allocation8], 6144  }
  0x2f   :  { %3252 = vsyncadd [#allocation8], 4294961152 }
  0x30   :  { %3253 = dma.done.wait [#allocation11], 1024  }
  0x31   :  { %3254 = vsyncadd [#allocation11], 4294966272  ;;  %v3263_v0 = vmov 0   ;;  %v3070_v1 = vld [vmem:[#allocation7 + $0x78] sm:$0xff]   ;;  %v3072_v3 = vld [vmem:[#allocation7 + $0x70] sm:$0xff]   ;;  %vm179_vm0 = vcmask 1040384  }
  0x32   :  { %99 = vst [vmem:[#allocation2] sm:$0xf] %v3263_v0  ;;  %100 = vst [vmem:[#allocation2 + $0xc] sm:$0xf] %v3263_v0  ;;  %v3071_v2 = vld [vmem:[#allocation7 + $0x38] sm:$0xff]   ;;  %2822 = vmatprep.subr.bf16.mxu0 %v3070_v1  ;;  %v3073_v4 = vld [vmem:[#allocation7 + $0x30] sm:$0xff]  }
  0x33   :  { %101 = vst [vmem:[#allocation2 + $0x18] sm:$0xf] %v3263_v0  ;;  %102 = vst [vmem:[#allocation2 + $0x24] sm:$0xf] %v3263_v0  ;;  %2854 = vmatprep.subr.bf16.mxu1 %v3071_v2  ;;  %2823 = vmatpush3.bf16.msra.mxu0 %v3070_v1  ;;  %v3074_v5 = vld [vmem:[#allocation7 + $0x68] sm:$0xff]   ;;  %v3076_v7 = vld [vmem:[#allocation7 + $0x60] sm:$0xff]  }
  0x34   :  { %103 = vst [vmem:[#allocation2 + $0x30] sm:$0xf] %v3263_v0  ;;  %104 = vst [vmem:[#allocation2 + $0x3c] sm:$0xf] %v3263_v0  ;;  %2855 = vmatpush3.bf16.msra.mxu1 %v3071_v2  ;;  %2824 = vmatprep.subr.bf16.mxu0 %v3072_v3  ;;  %v3075_v6 = vld [vmem:[#allocation7 + $0x28] sm:$0xff]   ;;  %v3077_v8 = vld [vmem:[#allocation7 + $0x20] sm:$0xff]  }
  0x35   :  { %105 = vst [vmem:[#allocation2 + $0x48] sm:$0xf] %v3263_v0  ;;  %106 = vst [vmem:[#allocation2 + $0x54] sm:$0xf] %v3263_v0  ;;  %2856 = vmatprep.subr.bf16.mxu1 %v3073_v4  ;;  %v3078_v9 = vld [vmem:[#allocation7 + $0x58] sm:$0xff]   ;;  %v3080_v11 = vld [vmem:[#allocation7 + $0x50] sm:$0xff]  }
  0x36   :  { %107 = vst [vmem:[#allocation3] sm:$0xf] %v3263_v0  ;;  %108 = vst [vmem:[#allocation3 + $0xc] sm:$0xf] %v3263_v0  ;;  %v3079_v10 = vld [vmem:[#allocation7 + $0x18] sm:$0xff]   ;;  %v3081_v15 = vld [vmem:[#allocation7 + $0x10] sm:$0xff]  }
  0x37   :  { %109 = vst [vmem:[#allocation3 + $0x18] sm:$0xf] %v3263_v0  ;;  %110 = vst [vmem:[#allocation3 + $0x24] sm:$0xf] %v3263_v0  ;;  %2825 = vmatpush3.bf16.msra.mxu0 %v3072_v3  ;;  %v3329_v12 = vld [vmem:[#allocation4] sm:$0xf] }
  0x38   :  { %111 = vst [vmem:[#allocation3 + $0x30] sm:$0xf] %v3263_v0  ;;  %112 = vst [vmem:[#allocation3 + $0x3c] sm:$0xf] %v3263_v0  ;;  %2857 = vmatpush3.bf16.msra.mxu1 %v3073_v4  ;;  %2826 = vmatprep.subr.bf16.mxu0 %v3074_v5  ;;  %v3331_v13 = vld [vmem:[#allocation4 + $0x4] sm:$0xf] }
  0x39   :  { %113 = vst [vmem:[#allocation3 + $0x48] sm:$0xf] %v3263_v0  ;;  %114 = vst [vmem:[#allocation3 + $0x54] sm:$0xf] %v3263_v0  ;;  %2858 = vmatprep.subr.bf16.mxu1 %v3075_v6  ;;  %v3333_v14 = vld [vmem:[#allocation2] sm:$0x8] }
  0x3a   :  { %115 = vst [vmem:[#allocation2 + $0x4] sm:$0xf] %v3329_v12  ;;  %116 = vst [vmem:[#allocation2 + $0x8] sm:$0xf] %v3331_v13  ;;  %vm262_vm1 = vsmask.f32 256 }
  0x3b   :  { %2827 = vmatpush3.bf16.msra.mxu0 %v3074_v5  ;;  %v266_v16 = vshrl.u32 %v3333_v14, 16  ;;  %v3338_v17 = vld [vmem:[#allocation4 + $0x8] sm:$0xf]  ;;  %v3340_v18 = vld [vmem:[#allocation4 + $0xc] sm:$0xf]  ;;  %vm180_vm3 = vcmask 1044484  }
  0x3c   :  { %2859 = vmatpush3.bf16.msra.mxu1 %v3075_v6  ;;  %2828 = vmatprep.subr.bf16.mxu0 %v3076_v7  ;;  %117 = vst [vmem:[#allocation2 + $0x10] sm:$0xf] %v3338_v17  ;;  %118 = vst [vmem:[#allocation2 + $0x14] sm:$0xf] %v3340_v18  ;;  %v3344_v19 = vld [vmem:[#allocation2 + $0xc] sm:$0x8] }
  0x3d   :  { %2860 = vmatprep.subr.bf16.mxu1 %v3077_v8  ;;  %v3082_v20 = vld [vmem:[#allocation7 + $0x48] sm:$0xff]   ;;  %vm263_vm2 = vsmask.f32 4368  ;;  %v288_v21 = vshrl.u32 %v3344_v19, 16  ;;  %v3347_v23 = vld [vmem:[#allocation4 + $0x10] sm:$0xf]  ;;  %vm3379_vm4 = vmor %vm179_vm0, %vm180_vm3 }
  0x3e   :  { %v3083_v22 = vld [vmem:[#allocation7 + $0x8] sm:$0xff]   ;;  %v3349_v24 = vrot.slane %v266_v16, 11  ;;  %v2428_v25 = vrot.slane %v3333_v14, 11  ;;  %v3352_v26 = vld [vmem:[#allocation4 + $0x14] sm:$0xf]  ;;  %v3084_v28 = vld [vmem:[#allocation7 + $0x40] sm:$0xff]  }
  0x3f   :  { %2829 = vmatpush3.bf16.msra.mxu0 %v3076_v7  ;;  %119 = vst [vmem:[#allocation2 + $0x1c] sm:$0xf] %v3347_v23  ;;  %v3355_v27 = vld [vmem:[#allocation2 + $0x18] sm:$0x8]  ;;  %v3357_v29 = vrot.slane %v288_v21, 11  ;;  %v2429_v30 = vrot.slane %v3344_v19, 11  ;;  %vm3394_vm5 = vmor %vm262_vm1, %vm263_vm2 }
  0x40   :  { %2861 = vmatpush3.bf16.msra.mxu1 %v3077_v8  ;;  %2830 = vmatprep.subr.bf16.mxu0 %v3078_v9  ;;  %120 = vst [vmem:[#allocation2 + $0x20] sm:$0xf] %v3352_v26  ;;  %v3361_v31 = vld [vmem:[#allocation4 + $0x18] sm:$0xf]  ;;  %v3363_v32 = vld [vmem:[#allocation4 + $0x1c] sm:$0xf] }
  0x41   :  { %2862 = vmatprep.subr.bf16.mxu1 %v3079_v10  ;;  %v3085_v33 = vld [vmem:[#allocation7] sm:$0xff]   ;;  %v310_v34 = vshrl.u32 %v3355_v27, 16  ;;  %v2430_v35 = vrot.slane %v3355_v27, 11  ;;  %121 = vst [vmem:[#allocation2 + $0x28] sm:$0xf] %v3361_v31  ;;  %v3086_v59 = vld [vmem:[#allocation7 + $0xb8] sm:$0xff]  }
  0x42   :  { %122 = vst [vmem:[#allocation2 + $0x2c] sm:$0xf] %v3363_v32  ;;  %v3369_v36 = vld [vmem:[#allocation2 + $0x4] sm:$0xf]  ;;  %v3371_v37 = vld [vmem:[#allocation2 + $0x8] sm:$0xf] }
  0x43   :  { %2831 = vmatpush3.bf16.msra.mxu0 %v3078_v9  ;;  %v133_v38 = vld [vmem:[#allocation2 + $0x8] sm:$0x7]  ;;  %v271_v39 = vshrl.u32 %v3369_v36, 16  ;;  %v274_v40 = vshll.u32 %v3369_v36, 16  ;;  %v280_v41 = vshrl.u32 %v3371_v37, 16  ;;  %v283_v42 = vshll.u32 %v3371_v37, 16 }
  0x44   :  { %2863 = vmatpush3.bf16.msra.mxu1 %v3079_v10  ;;  %2832 = vmatprep.subr.bf16.mxu0 %v3080_v11  ;;  %v3383_v44 = vld [vmem:[#allocation2 + $0x10] sm:$0xf]  ;;  %v184_v45 = vrot.slane %v3369_v36, 7  ;;  %v187_v46 = vrot.slane %v133_v38, 7  ;;  %v3386_v47 = vld [vmem:[#allocation2 + $0x14] sm:$0xf] }
  0x45   :  { %2864 = vmatprep.subr.bf16.mxu1 %v3081_v15  ;;  %v293_v48 = vshrl.u32 %v3383_v44, 16  ;;  %v296_v49 = vshll.u32 %v3383_v44, 16  ;;  %v273_v50 = vrot.slane %v271_v39, 7  ;;  %v282_v51 = vrot.slane %v280_v41, 7  ;;  %v136_v0 = vld [vmem:[#allocation2 + $0x14] sm:$0x7] }
  0x46   :  { %v302_v52 = vshrl.u32 %v3386_v47, 16  ;;  %v305_v53 = vshll.u32 %v3386_v47, 16  ;;  %v185_v55 = vsel %vm3379_vm4, %v2428_v25, %v184_v45  ;;  %v186_v56 = vrot.slane %v184_v45, 4  ;;  %v3405_v5 = vld [vmem:[#allocation2 + $0x1c] sm:$0xf]  ;;  %v3087_v25 = vld [vmem:[#allocation7 + $0xb0] sm:$0xff]  }
  0x47   :  { %2833 = vmatpush3.bf16.msra.mxu0 %v3080_v11  ;;  %v295_v57 = vrot.slane %v293_v48, 7  ;;  %v191_v58 = vrot.slane %v3383_v44, 7  ;;  %v276_v60 = vor.u32 %v274_v40, %v273_v50  ;;  %v278_v61 = vrot.slane %v273_v50, 4  ;;  %v3407_v6 = vld [vmem:[#allocation2 + $0x20] sm:$0xf] }
  0x48   :  { %2865 = vmatpush3.bf16.msra.mxu1 %v3081_v15  ;;  %2834 = vmatprep.subr.bf16.mxu0 %v3082_v20  ;;  %v285_v62 = vor.u32 %v283_v42, %v282_v51  ;;  %v304_v63 = vrot.slane %v302_v52, 7  ;;  %v188_v1 = vsel %vm3379_vm4, %v186_v56, %v187_v46  ;;  %v139_v11 = vld [vmem:[#allocation2 + $0x20] sm:$0x7]  ;;  %v3414_v14 = vld [vmem:[#allocation2 + $0x24] sm:$0x8]  ;;  %v324_v40 = vshrl.u32 %v3407_v6, 16 }
  0x49   :  { %2866 = vmatprep.subr.bf16.mxu1 %v3083_v22  ;;  %v298_v2 = vor.u32 %v296_v49, %v295_v57  ;;  %v300_v3 = vrot.slane %v295_v57, 4  ;;  %v192_v4 = vsel %vm3379_vm4, %v2429_v30, %v191_v58  ;;  %v277_v7 = vsel %vm3394_vm5, %v3349_v24, %v276_v60  ;;  %v3419_v21 = vld [vmem:[#allocation4 + $0x20] sm:$0xf]  ;;  %v3439_v42 = vld [vmem:[#allocation4 + $0x2c] sm:$0xf] }
  0x4a   :  { %v286_v8 = vsel %vm3394_vm5, %v278_v61, %v285_v62  ;;  %v2460_v9 = vcombine.low %v185_v55, %v188_v1  ;;  %v307_v10 = vor.u32 %v305_v53, %v304_v63  ;;  %v193_v19 = vrot.slane %v191_v58, 4  ;;  %123 = vst [vmem:[#allocation2 + $0x34] sm:$0xf] %v3419_v21  ;;  %v3442_v50 = vld [vmem:[#allocation2 + $0x2c] sm:$0xf] }
  0x4b   :  { %2835 = vmatpush3.bf16.msra.mxu0 %v3082_v20  ;;  %v2444_v15 = vcombine.low %v277_v7, %v286_v8  ;;  %v299_v16 = vsel %vm3394_vm5, %v3357_v29, %v298_v2  ;;  %v194_v20 = vrot.slane %v136_v0, 7  ;;  %v315_v30 = vshrl.u32 %v3405_v5, 16  ;;  %v3429_v29 = vld [vmem:[#allocation2 + $0x28] sm:$0xf]  ;;  %126 = vst [vmem:[#allocation2 + $0x44] sm:$0xf] %v3439_v42 }
  0x4c   :  { %2867 = vmatpush3.bf16.msra.mxu1 %v3083_v22  ;;  %2836 = vmatprep.subr.bf16.mxu0 %v3084_v28  ;;  %v3421_v22 = vld [vmem:[#allocation4 + $0x24] sm:$0xf]  ;;  %v308_v24 = vsel %vm3394_vm5, %v300_v3, %v307_v10  ;;  %v327_v41 = vshll.u32 %v3407_v6, 16  ;;  %v198_v48 = vrot.slane %v3405_v5, 7  ;;  %v201_v49 = vrot.slane %v139_v11, 7  ;;  %v3088_v3 = vld [vmem:[#allocation7 + $0xa8] sm:$0xff]  }
  0x4d   :  { %2868 = vmatprep.subr.bf16.mxu1 %v3085_v33  ;;  %2870 = vmatprep.mubr.bf16.mxu1 %v2460_v9  ;;  %124 = vst [vmem:[#allocation2 + $0x38] sm:$0xf] %v3421_v22  ;;  %v2445_v38 = vcombine.low %v299_v16, %v308_v24  ;;  %v195_v39 = vsel %vm3379_vm4, %v193_v19, %v194_v20  ;;  %v317_v46 = vrot.slane %v315_v30, 7  ;;  %v326_v51 = vrot.slane %v324_v40, 7  ;;  %v142_v56 = vld [vmem:[#allocation2 + $0x2c] sm:$0x7] }
  0x4e   :  { %2838 = vmatprep.mubr.bf16.mxu0 %v2444_v15  ;;  %v2461_v45 = vcombine.low %v192_v4, %v195_v39  ;;  %v332_v52 = vshrl.u32 %v3414_v14, 16  ;;  %v337_v53 = vshrl.u32 %v3429_v29, 16  ;;  %v340_v55 = vshll.u32 %v3429_v29, 16  ;;  %v3453_v62 = vld [vmem:[#allocation2 + $0x30] sm:$0x8] }
  0x4f   :  { %2837 = vmatpush3.bf16.msra.mxu0 %v3084_v28  ;;  %v2438_v28 = vrot.slane %v310_v34, 11  ;;  %v3437_v34 = vld [vmem:[#allocation4 + $0x28] sm:$0xf]  ;;  %v322_v58 = vrot.slane %v317_v46, 4  ;;  %v199_v60 = vsel %vm3379_vm4, %v2430_v35, %v198_v48  ;;  %v200_v61 = vrot.slane %v198_v48, 4 }
  0x50   :  { %2869 = vmatpush3.bf16.msra.mxu1 %v3085_v33  ;;  %2886 = vmatprep.subr.bf16.mxu0 %v3086_v59  ;;  %v318_v33 = vshll.u32 %v3405_v5, 16  ;;  %4056 = vst [vmem:[#allocation17_spill] sm:$0xff] %v3437_v34  ;;  %125 = vst [vmem:[#allocation2 + $0x40] sm:$0xf] %v3437_v34  ;;  %v329_v63 = vor.u32 %v327_v41, %v326_v51  ;;  %v2439_v0 = vrot.slane %v332_v52, 11  ;;  %v339_v1 = vrot.slane %v337_v53, 7 }
  0x51   :  { %v346_v2 = vshrl.u32 %v3442_v50, 16  ;;  %v202_v4 = vsel %vm3379_vm4, %v200_v61, %v201_v49  ;;  %v349_v27 = vshll.u32 %v3442_v50, 16  ;;  %v2431_v35 = vrot.slane %v3414_v14, 11  ;;  %v3462_v7 = vld [vmem:[#allocation4 + $0x30] sm:$0xf] }
  0x52   :  { %2839 = vmatmul.mubr.bf16.vlgmr.msra.gmra.mxu0 %v2445_v38  ;;  %v320_v57 = vor.u32 %v318_v33, %v317_v46  ;;  %4057 = vst [vmem:[#allocation18_spill] sm:$0xff] %v3462_v7  ;;  %v3464_v8 = vld [vmem:[#allocation4 + $0x34] sm:$0xf]  ;;  %v330_v9 = vsel %vm3394_vm5, %v322_v58, %v329_v63  ;;  %v2462_v10 = vcombine.low %v199_v60, %v202_v4  ;;  %v344_v15 = vrot.slane %v339_v1, 4  ;;  %v3089_v33 = vld [vmem:[#allocation7 + $0xa0] sm:$0xff]  }
  0x53   :  { %2871 = vmatmul.mubr.bf16.vlgmr.msra.gmra.mxu1 %v2461_v45  ;;  %2887 = vmatpush3.bf16.msra.mxu0 %v3086_v59  ;;  %4058 = vst [vmem:[#allocation19_spill] sm:$0xff] %v3464_v8  ;;  %v342_v11 = vor.u32 %v340_v55, %v339_v1  ;;  %v3468_v16 = vld [vmem:[#allocation2 + $0x34] sm:$0xf]  ;;  %127 = vst [vmem:[#allocation2 + $0x4c] sm:$0xf] %v3462_v7  ;;  %v348_v20 = vrot.slane %v346_v2, 7 }
  0x54   :  { %2888 = vmatprep.subr.bf16.mxu0 %v3087_v25  ;;  %v321_v59 = vsel %vm3394_vm5, %v2438_v28, %v320_v57  ;;  %v3470_v19 = vld [vmem:[#allocation2 + $0x38] sm:$0xf]  ;;  %128 = vst [vmem:[#allocation2 + $0x50] sm:$0xf] %v3464_v8  ;;  %v205_v24 = vrot.slane %v3429_v29, 7  ;;  %v208_v28 = vrot.slane %v142_v56, 7  ;;  %2874 = vmatprep.mubr.bf16.mxu1 %v2462_v10 }
  0x55   :  { %v2446_v14 = vcombine.low %v321_v59, %v330_v9  ;;  %v343_v30 = vsel %vm3394_vm5, %v2439_v0, %v342_v11  ;;  %v354_v38 = vshrl.u32 %v3453_v62, 16  ;;  %v359_v39 = vshrl.u32 %v3468_v16, 16  ;;  %v145_v48 = vld [vmem:[#allocation2 + $0x38] sm:$0x7]  ;;  %v146_v49 = vld [vmem:[#allocation2 + $0x3c] sm:$0x8] }
  0x56   :  { %v362_v40 = vshll.u32 %v3468_v16, 16  ;;  %v351_v41 = vor.u32 %v349_v27, %v348_v20  ;;  %v207_v45 = vrot.slane %v205_v24, 4  ;;  %v368_v46 = vshrl.u32 %v3470_v19, 16  ;;  %v3492_v63 = vld [vmem:[#allocation4 + $0x38] sm:$0xf] }
  0x57   :  { %2889 = vmatpush3.bf16.msra.mxu0 %v3087_v25  ;;  %2842 = vmatprep.mubr.bf16.mxu0 %v2446_v14  ;;  %v206_v25 = vsel %vm3379_vm4, %v2431_v35, %v205_v24  ;;  %v2440_v51 = vrot.slane %v354_v38, 11  ;;  %v361_v52 = vrot.slane %v359_v39, 7  ;;  %v371_v53 = vshll.u32 %v3470_v19, 16  ;;  %v3485_v56 = vld [vmem:[#allocation2 + $0x40] sm:$0xf]  ;;  %4059 = vst [vmem:[#allocation20_spill] sm:$0xff] %v3492_v63 }
  0x58   :  { %2890 = vmatprep.subr.bf16.mxu0 %v3088_v3  ;;  %v2432_v55 = vrot.slane %v3453_v62, 11  ;;  %v352_v57 = vsel %vm3394_vm5, %v344_v15, %v351_v41  ;;  %v209_v58 = vsel %vm3379_vm4, %v207_v45, %v208_v28  ;;  %v370_v60 = vrot.slane %v368_v46, 7  ;;  %v3494_v0 = vld [vmem:[#allocation4 + $0x3c] sm:$0xf]  ;;  %v3496_v4 = vld [vmem:[#allocation2 + $0x44] sm:$0xf] }
  0x59   :  { %v212_v61 = vrot.slane %v3468_v16, 7  ;;  %4060 = vst [vmem:[#allocation21_spill] sm:$0xff] %v3494_v0  ;;  %v2447_v1 = vcombine.low %v343_v30, %v352_v57  ;;  %v2463_v2 = vcombine.low %v206_v25, %v209_v58  ;;  %v364_v62 = vor.u32 %v362_v40, %v361_v52  ;;  %v3090_v27 = vld [vmem:[#allocation7 + $0x98] sm:$0xff]   ;;  %129 = vst [vmem:[#allocation2 + $0x58] sm:$0xf] %v3492_v63  ;;  %v3091_v30 = vld [vmem:[#allocation7 + $0x90] sm:$0xff]  }
  0x5a   :  { %v366_v59 = vrot.slane %v361_v52, 4  ;;  %130 = vst [vmem:[#allocation2 + $0x5c] sm:$0xf] %v3494_v0  ;;  %v215_v10 = vrot.slane %v145_v48, 7  ;;  %v148_v11 = vld [vmem:[#allocation2 + $0x44] sm:$0x7] }
  0x5b   :  { %2891 = vmatpush3.bf16.msra.mxu0 %v3088_v3  ;;  %v373_v3 = vor.u32 %v371_v53, %v370_v60  ;;  %v213_v35 = vsel %vm3379_vm4, %v2432_v55, %v212_v61  ;;  %v214_v9 = vrot.slane %v212_v61, 4  ;;  %v3502_v15 = vld [vmem:[#allocation2 + $0x48] sm:$0x8]  ;;  %2875 = vmatmul.mubr.bf16.gmra.mxu1 %v2463_v2  ;;  %v365_v14 = vsel %vm3394_vm5, %v2440_v51, %v364_v62  ;;  %v3508_v38 = vld [vmem:[#allocation2 + $0x4c] sm:$0xf] }
  0x5c   :  { %2892 = vmatprep.subr.bf16.mxu0 %v3089_v33  ;;  %2843 = vmatmul.mubr.bf16.gmra.mxu0 %v2447_v1  ;;  %v376_v20 = vshrl.u32 %v146_v49, 16  ;;  %v381_v24 = vshrl.u32 %v3485_v56, 16  ;;  %v384_v28 = vshll.u32 %v3485_v56, 16  ;;  %v390_v41 = vshrl.u32 %v3496_v4, 16  ;;  %v3516_v45 = vld [vmem:[#allocation2 + $0x50] sm:$0xf] }
  0x5d   :  { %v374_v39 = vsel %vm3394_vm5, %v366_v59, %v373_v3  ;;  %v216_v40 = vsel %vm3379_vm4, %v214_v9, %v215_v10  ;;  %v393_v25 = vshll.u32 %v3496_v4, 16  ;;  %v2433_v55 = vrot.slane %v146_v49, 11  ;;  %v152_v2 = vld [vmem:[#allocation2 + $0x54] sm:$0x8] }
  0x5e   :  { %v2448_v46 = vcombine.low %v365_v14, %v374_v39  ;;  %v2464_v48 = vcombine.low %v213_v35, %v216_v40  ;;  %v2441_v51 = vrot.slane %v376_v20, 11  ;;  %v383_v52 = vrot.slane %v381_v24, 7  ;;  %v151_v35 = vld [vmem:[#allocation2 + $0x50] sm:$0x7] }
  0x5f   :  { %2893 = vmatpush3.bf16.msra.mxu0 %v3089_v33  ;;  %v392_v53 = vrot.slane %v390_v41, 7  ;;  %v219_v33 = vrot.slane %v3485_v56, 7  ;;  %v222_v57 = vrot.slane %v148_v11, 7  ;;  %v398_v61 = vshrl.u32 %v3502_v15, 16 }
  0x60   :  { %2894 = vmatprep.subr.bf16.mxu0 %v3090_v27  ;;  %2846 = vmatprep.mubr.bf16.mxu0 %v2448_v46  ;;  %v386_v58 = vor.u32 %v384_v28, %v383_v52  ;;  %v388_v60 = vrot.slane %v383_v52, 4  ;;  %v403_v1 = vshrl.u32 %v3508_v38, 16  ;;  %v406_v49 = vshll.u32 %v3508_v38, 16  ;;  %v3524_v9 = vld [vmem:[#allocation2 + $0x58] sm:$0xf]  ;;  %v3092_v28 = vld [vmem:[#allocation7 + $0x88] sm:$0xff]  }
  0x61   :  { %2878 = vmatprep.mubr.bf16.mxu1 %v2464_v48  ;;  %v395_v62 = vor.u32 %v393_v25, %v392_v53  ;;  %v220_v59 = vsel %vm3379_vm4, %v2433_v55, %v219_v33  ;;  %v221_v3 = vrot.slane %v219_v33, 4  ;;  %v2442_v11 = vrot.slane %v398_v61, 11  ;;  %v3529_v24 = vld [vmem:[#allocation2 + $0x5c] sm:$0xf] }
  0x62   :  { %v387_v10 = vsel %vm3394_vm5, %v2441_v51, %v386_v58  ;;  %v405_v14 = vrot.slane %v403_v1, 7  ;;  %v412_v20 = vshrl.u32 %v3516_v45, 16  ;;  %v415_v40 = vshll.u32 %v3516_v45, 16  ;;  %v154_v52 = vld [vmem:[#allocation2 + $0x5c] sm:$0x7]  ;;  %v3093_v1 = vld [vmem:[#allocation7 + $0x80] sm:$0xff]  }
  0x63   :  { %2895 = vmatpush3.bf16.msra.mxu0 %v3090_v27  ;;  %v396_v39 = vsel %vm3394_vm5, %v388_v60, %v395_v62  ;;  %v223_v27 = vsel %vm3379_vm4, %v221_v3, %v222_v57  ;;  %v2434_v41 = vrot.slane %v3502_v15, 11  ;;  %v226_v55 = vrot.slane %v3508_v38, 7 }
  0x64   :  { %2896 = vmatprep.subr.bf16.mxu0 %v3091_v30  ;;  %v2449_v25 = vcombine.low %v387_v10, %v396_v39  ;;  %v2465_v46 = vcombine.low %v220_v59, %v223_v27  ;;  %v408_v48 = vor.u32 %v406_v49, %v405_v14  ;;  %v410_v51 = vrot.slane %v405_v14, 4 }
  0x65   :  { %v414_v53 = vrot.slane %v412_v20, 7  ;;  %v229_v33 = vrot.slane %v151_v35, 7  ;;  %v420_v58 = vshrl.u32 %v152_v2, 16  ;;  %v425_v60 = vshrl.u32 %v3524_v9, 16 }
  0x66   :  { %2847 = vmatmul.mubr.bf16.gmra.mxu0 %v2449_v25  ;;  %2879 = vmatmul.mubr.bf16.gmra.mxu1 %v2465_v46  ;;  %v409_v57 = vsel %vm3394_vm5, %v2442_v11, %v408_v48  ;;  %v428_v15 = vshll.u32 %v3524_v9, 16  ;;  %v434_v61 = vshrl.u32 %v3529_v24, 16  ;;  %v228_v59 = vrot.slane %v226_v55, 4 }
  0x67   :  { %2897 = vmatpush3.bf16.msra.mxu0 %v3091_v30  ;;  %v417_v62 = vor.u32 %v415_v40, %v414_v53  ;;  %v227_v30 = vsel %vm3379_vm4, %v2434_v41, %v226_v55  ;;  %v2443_v3 = vrot.slane %v420_v58, 11  ;;  %v427_v49 = vrot.slane %v425_v60, 7 }
  0x68   :  { %2898 = vmatprep.subr.bf16.mxu0 %v3092_v28  ;;  %v436_v35 = vrot.slane %v434_v61, 7  ;;  %v437_v10 = vshll.u32 %v3529_v24, 16  ;;  %v2435_v14 = vrot.slane %v152_v2, 11  ;;  %v230_v20 = vsel %vm3379_vm4, %v228_v59, %v229_v33  ;;  %v3575_v59 = vld [vmem:[#allocation9 + $0xb8] sm:$0xff]  }
  0x69   :  { %v418_v11 = vsel %vm3394_vm5, %v410_v51, %v417_v62  ;;  %v233_v39 = vrot.slane %v3524_v9, 7  ;;  %v236_v27 = vrot.slane %v154_v52, 7  ;;  %v2466_v41 = vcombine.low %v227_v30, %v230_v20  ;;  %v3115_v62 = vld [vmem:[#allocation9] sm:$0xff]  }
  0x6a   :  { %v2450_v40 = vcombine.low %v409_v57, %v418_v11  ;;  %v430_v25 = vor.u32 %v428_v15, %v427_v49  ;;  %v432_v46 = vrot.slane %v427_v49, 4  ;;  %v439_v48 = vor.u32 %v437_v10, %v436_v35  ;;  %v3116_v30 = vld [vmem:[#allocation9 + $0x40] sm:$0xff]  }
  0x6b   :  { %2899 = vmatpush3.bf16.msra.mxu0 %v3092_v28  ;;  %v234_v53 = vsel %vm3379_vm4, %v2435_v14, %v233_v39  ;;  %v235_v2 = vrot.slane %v233_v39, 4  ;;  %2882 = vmatprep.mubr.bf16.mxu1 %v2466_v41  ;;  %v2476_v52 = vcombine.low %v3369_v36, %v3371_v37  ;;  %v2477_v57 = vcombine.low %v3383_v44, %v3386_v47  ;;  %v3101_v47 = vld [vmem:[#allocation9 + $0x38] sm:$0xff]  }
  0x6c   :  { %2900 = vmatprep.subr.bf16.mxu0 %v3093_v1  ;;  %2850 = vmatprep.mubr.bf16.mxu0 %v2450_v40  ;;  %v431_v51 = vsel %vm3394_vm5, %v2443_v3, %v430_v25  ;;  %v440_v55 = vsel %vm3394_vm5, %v432_v46, %v439_v48  ;;  %v2478_v60 = vcombine.low %v3405_v5, %v3407_v6  ;;  %v3102_v5 = vld [vmem:[#allocation9 + $0x78] sm:$0xff]   ;;  %v3103_v6 = vld [vmem:[#allocation9 + $0x30] sm:$0xff]  }
  0x6d   :  { %v237_v28 = vsel %vm3379_vm4, %v235_v2, %v236_v27  ;;  %v2451_v33 = vcombine.low %v431_v51, %v440_v55  ;;  %v2479_v15 = vcombine.low %v3429_v29, %v3442_v50  ;;  %v2480_v61 = vcombine.low %v3468_v16, %v3470_v19  ;;  %2918 = vmatprep.subr.bf16.mxu1 %v3102_v5  ;;  %v3104_v29 = vld [vmem:[#allocation9 + $0x70] sm:$0xff]   ;;  %v3105_v50 = vld [vmem:[#allocation9 + $0x28] sm:$0xff]   ;;  %v3107_v19 = vld [vmem:[#allocation9 + $0x20] sm:$0xff]  }
  0x6e   :  { %v2467_v58 = vcombine.low %v234_v53, %v237_v28  ;;  %v2481_v36 = vcombine.low %v3485_v56, %v3496_v4  ;;  %v2482_v37 = vcombine.low %v3508_v38, %v3516_v45  ;;  %v2483_v44 = vcombine.low %v3524_v9, %v3529_v24  ;;  %2919 = vmatpush3.bf16.msra.mxu1 %v3102_v5  ;;  %v3106_v16 = vld [vmem:[#allocation9 + $0x68] sm:$0xff]   ;;  %v3108_v56 = vld [vmem:[#allocation9 + $0x60] sm:$0xff]   ;;  %v3109_v4 = vld [vmem:[#allocation9 + $0x18] sm:$0xff]  }
  0x6f   :  { %2901 = vmatpush3.bf16.msra.mxu0 %v3093_v1  ;;  %2920 = vmatprep.subr.bf16.mxu1 %v3104_v29  ;;  %v3110_v38 = vld [vmem:[#allocation9 + $0x58] sm:$0xff]   ;;  %v3111_v45 = vld [vmem:[#allocation9 + $0x10] sm:$0xff]   ;;  %v3113_v24 = vld [vmem:[#allocation9 + $0x8] sm:$0xff]  }
  0x70   :  { %2851 = vmatmul.mubr.bf16.gmra.mxu0 %v2451_v33  ;;  %2883 = vmatmul.mubr.bf16.gmra.mxu1 %v2467_v58  ;;  %v3112_v9 = vld [vmem:[#allocation9 + $0x50] sm:$0xff]   ;;  %v3114_v1 = vld [vmem:[#allocation9 + $0x48] sm:$0xff]   ;;  %v3578_v3 = vld [vmem:[#allocation10 + $0x38] sm:$0xff]  }
  0x71   :  { %2902 = vmatprep.mubr.bf16.mxu0 %v2476_v52  ;;  %2950 = vmatprep.subr.bf16.mxu0 %v3101_v47 }
  0x72   :  { %2921 = vmatpush3.bf16.msra.mxu1 %v3104_v29 }
  0x73   :  { %2922 = vmatprep.subr.bf16.mxu1 %v3106_v16 }
  0x76   :  { %2923 = vmatpush3.bf16.msra.mxu1 %v3106_v16  ;;  %v3616_v16 = vld [vmem:[#allocation3] sm:$0x8] }
  0x77   :  { %2924 = vmatprep.subr.bf16.mxu1 %v3108_v56 }
  0x78   :  { %2903 = vmatmul.mubr.bf16.vlgmr.msra.gmra.mxu0 %v2477_v57 }
  0x79   :  { %2906 = vmatprep.mubr.bf16.mxu0 %v2478_v60  ;;  %2951 = vmatpush3.bf16.msra.mxu0 %v3101_v47 }
  0x7a   :  { %2952 = vmatprep.subr.bf16.mxu0 %v3103_v6  ;;  %2925 = vmatpush3.bf16.msra.mxu1 %v3108_v56 }
  0x7b   :  { %2926 = vmatprep.subr.bf16.mxu1 %v3110_v38 }
  0x7d   :  { %2953 = vmatpush3.bf16.msra.mxu0 %v3103_v6 }
  0x7e   :  { %2954 = vmatprep.subr.bf16.mxu0 %v3105_v50  ;;  %2927 = vmatpush3.bf16.msra.mxu1 %v3110_v38 }
  0x7f   :  { %2928 = vmatprep.subr.bf16.mxu1 %v3112_v9 }
  0x80   :  { %2907 = vmatmul.mubr.bf16.gmra.mxu0 %v2479_v15 }
  0x81   :  { %2910 = vmatprep.mubr.bf16.mxu0 %v2480_v61  ;;  %2955 = vmatpush3.bf16.msra.mxu0 %v3105_v50  ;;  %v3614_v50 = vld [vmem:[%s4041_s2] ss:$0 sm:$0xff] }
  0x82   :  { %2956 = vmatprep.subr.bf16.mxu0 %v3107_v19  ;;  %2929 = vmatpush3.bf16.msra.mxu1 %v3112_v9 }
  0x83   :  { %2930 = vmatprep.subr.bf16.mxu1 %v3114_v1 }
  0x85   :  { %2957 = vmatpush3.bf16.msra.mxu0 %v3107_v19  ;;  %v3618_v19 = vld [vmem:[#allocation3 + $0xc] sm:$0x8] }
  0x86   :  { %2958 = vmatprep.subr.bf16.mxu0 %v3109_v4  ;;  %2931 = vmatpush3.bf16.msra.mxu1 %v3114_v1  ;;  %v1300_v38 = vshrl.u32 %v3618_v19, 16 }
  0x87   :  { %2932 = vmatprep.subr.bf16.mxu1 %v3116_v30 }
  0x88   :  { %2911 = vmatmul.mubr.bf16.gmra.mxu0 %v2481_v36 }
  0x89   :  { %2914 = vmatprep.mubr.bf16.mxu0 %v2482_v37  ;;  %2959 = vmatpush3.bf16.msra.mxu0 %v3109_v4  ;;  %v1278_v4 = vshrl.u32 %v3616_v16, 16 }
  0x8a   :  { %2960 = vmatprep.subr.bf16.mxu0 %v3111_v45  ;;  %2933 = vmatpush3.bf16.msra.mxu1 %v3116_v30 }
  0x8b   :  { %2982 = vmatprep.subr.bf16.mxu1 %v3575_v59  ;;  %v3630_v63 = vrot.slane %v1278_v4, 11 }
  0x8d   :  { %2961 = vmatpush3.bf16.msra.mxu0 %v3111_v45 }
  0x8e   :  { %2962 = vmatprep.subr.bf16.mxu0 %v3113_v24 }
  0x90   :  { %2915 = vmatmul.mubr.bf16.gmra.mxu0 %v2483_v44 }
  0x91   :  { %2963 = vmatpush3.bf16.msra.mxu0 %v3113_v24 }
  0x92   :  { %2964 = vmatprep.subr.bf16.mxu0 %v3115_v62 }
  0x95   :  { %2965 = vmatpush3.bf16.msra.mxu0 %v3115_v62 }
  0x96   :  { %3014 = vmatprep.subr.bf16.mxu0 %v3578_v3 }
 0x112   :  { %v2840_v49 = vpop.f32.mrf.mxu0 }
 0x113   :  { %v2872_v35 = vpop.f32.mrf.mxu1 }
 0x114   :  { %v572_v10 = vpop.f32.mrf.mxu0  ;;  %v758_v44 = vadd.f32 %v2872_v35, %v2840_v49 }
 0x115   :  { %v749_v14 = vpop.f32.mrf.mxu1 }
 0x116   :  { %v2841_v11 = vpop.f32.mrf.mxu0  ;;  %v750_v5 = vadd.f32 %v749_v14, %v572_v10  ;;  %v3627_v14 = vld [vmem:[#allocation3 + $0x18] sm:$0x8] }
 0x117   :  { %v2873_v20 = vpop.f32.mrf.mxu1 }
 0x118   :  { %v575_v39 = vpop.f32.mrf.mxu0  ;;  %v761_v45 = vadd.f32 %v2873_v20, %v2841_v11  ;;  %v3632_v11 = vrot.slane %v1300_v38, 11  ;;  %v1322_v20 = vshrl.u32 %v3627_v14, 16 }
 0x119   :  { %v752_v27 = vpop.f32.mrf.mxu1 }
 0x11a   :  { %v753_v62 = vadd.f32 %v752_v27, %v575_v39 }
 0x11b   :  { %v2876_v41 = vpop.f32.mrf.mxu1 }
 0x11c   :  { %v2844_v40 = vpop.f32.mrf.mxu0 }
 0x11d   :  { %v765_v48 = vpop.f32.mrf.mxu1 }
 0x11e   :  { %v588_v25 = vpop.f32.mrf.mxu0 }
 0x11f   :  { %v2877_v2 = vpop.f32.mrf.mxu1 }
 0x120   :  { %v3581_v46 = vpop.f32.mrf.mxu0 }
 0x121   :  { %v3589_v28 = vpop.f32.mrf.mxu1 }
 0x122   :  { %v3583_v53 = vpop.f32.mrf.mxu0 }
 0x126   :  { %v3585_v51 = vpop.f32.mrf.mxu0  ;;  %v3595_v58 = vpop.f32.mrf.mxu1 }
 0x127   :  { %v790_v34 = vadd.f32 %v3595_v58, %v3585_v51 }
 0x128   :  { %v3587_v55 = vpop.f32.mrf.mxu0  ;;  %v3599_v60 = vpop.f32.mrf.mxu1 }
 0x12a   :  { %v3591_v52 = vpop.f32.mrf.mxu0  ;;  %v3605_v36 = vpop.f32.mrf.mxu1 }
 0x12b   :  { %v793_v58 = vadd.f32 %v3605_v36, %v3591_v52 }
 0x12c   :  { %v3593_v33 = vpop.f32.mrf.mxu0  ;;  %v3609_v6 = vpop.f32.mrf.mxu1 }
 0x130   :  { %v3597_v57 = vpop.f32.mrf.mxu0  ;;  %v3623_v30 = vpop.f32.mrf.mxu1 }
 0x132   :  { %v3601_v15 = vpop.f32.mrf.mxu0  ;;  %v797_v4 = vpop.f32.mrf.mxu1 }
 0x134   :  { %v3603_v61 = vpop.f32.mrf.mxu0 }
 0x136   :  { %v3607_v37 = vpop.f32.mrf.mxu0 }
 0x138   :  { %v2904_v47 = vpop.f32.mrf.mxu0 }
 0x139   :  { %v1016_v29 = vadd.f32 %v2904_v47, %v758_v44 }
 0x13a   :  { %v951_v56 = vpop.f32.mrf.mxu0 }
 0x13b   :  { %v1014_v9 = vadd.f32 %v951_v56, %v750_v5  ;;  %v1039_v24 = vadd.f32 %v3614_v50, %v1016_v29  ;;  %v774_v5 = vadd.f32 %v2876_v41, %v2844_v40  ;;  %v3636_v56 = vld [vmem:[#allocation3 + $0x24] sm:$0x8]  ;;  %v3641_v40 = vld [vmem:[#allocation3 + $0x30] sm:$0x8]  ;;  %v3643_v41 = vld [vmem:[#allocation3 + $0x3c] sm:$0x8] }
 0x13c   :  { %v2905_v1 = vpop.f32.mrf.mxu0  ;;  %v1344_v47 = vshrl.u32 %v3636_v56, 16 }
 0x13d   :  { %v1037_v49 = vadd.f32 %v3614_v50, %v1014_v9  ;;  %v1017_v35 = vadd.f32 %v2905_v1, %v761_v45  ;;  %v766_v45 = vadd.f32 %v765_v48, %v588_v25  ;;  %v1055_v9 = vmax.f32 %v1039_v24, 0.0 }
 0x13e   :  { %v954_v44 = vpop.f32.mrf.mxu0  ;;  %v3646_v25 = vrot.slane %v1322_v20, 11  ;;  %v1366_v48 = vshrl.u32 %v3641_v40, 16  ;;  %v1388_v24 = vshrl.u32 %v3643_v41, 16 }
 0x13f   :  { %v1053_v39 = vmax.f32 %v1037_v49, 0.0  ;;  %v1040_v27 = vadd.f32 %v3614_v50, %v1017_v35  ;;  %v1015_v29 = vadd.f32 %v954_v44, %v753_v62  ;;  %v777_v35 = vadd.f32 %v2877_v2, %v3581_v46 }
 0x140   :  { %v2908_v1 = vpop.f32.mrf.mxu0  ;;  %v3656_v49 = vrot.slane %v1344_v47, 11  ;;  %v769_v46 = vadd.f32 %v3589_v28, %v3583_v53 }
 0x141   :  { %v2607_v0 = vpack.c.bf16 %v1053_v39, %v1053_v39  ;;  %v1056_v38 = vmax.f32 %v1040_v27, 0.0  ;;  %v1038_v7 = vadd.f32 %v3614_v50, %v1015_v29  ;;  %v1020_v8 = vadd.f32 %v2908_v1, %v774_v5  ;;  %v3651_v5 = vld [vmem:[#allocation3 + $0x48] sm:$0x8]  ;;  %v3653_v29 = vld [vmem:[#allocation3 + $0x54] sm:$0x8] }
 0x142   :  { %v967_v62 = vpop.f32.mrf.mxu0 }
 0x143   :  { %1133 = vst [vmem:[#allocation3 + $0x4] sm:$0xf] %v2607_v0  ;;  %v2642_v44 = vpack.c.bf16 %v1056_v38, %v1055_v9  ;;  %v1054_v39 = vmax.f32 %v1038_v7, 0.0  ;;  %v1018_v27 = vadd.f32 %v967_v62, %v766_v45  ;;  %v1043_v1 = vadd.f32 %v3614_v50, %v1020_v8  ;;  %v2885_v0 = vpop.f32.mrf.mxu1 }
 0x144   :  { %v2909_v10 = vpop.f32.mrf.mxu0  ;;  %v3663_v38 = vrot.slane %v1366_v48, 11  ;;  %v3665_v8 = vrot.slane %v1388_v24, 11  ;;  %v1410_v24 = vshrl.u32 %v3651_v5, 16 }
 0x145   :  { %2699 = vst [vmem:[#allocation3 + $0x10] sm:$0xff] %v2642_v44   ;;  %v2608_v7 = vpack.c.bf16 %v1054_v39, %v1054_v39  ;;  %v1041_v2 = vadd.f32 %v3614_v50, %v1018_v27  ;;  %v1021_v45 = vadd.f32 %v2909_v10, %v777_v35  ;;  %v782_v10 = vadd.f32 %v3599_v60, %v3587_v55  ;;  %v800_v27 = vpop.f32.mrf.mxu1 }
 0x146   :  { %v970_v9 = vpop.f32.mrf.mxu0  ;;  %v1059_v35 = vmax.f32 %v1043_v1, 0.0  ;;  %v1432_v39 = vshrl.u32 %v3653_v29, 16  ;;  %v806_v55 = vadd.f32 %v3623_v30, %v3597_v57  ;;  %v798_v60 = vadd.f32 %v797_v4, %v3601_v15 }
 0x147   :  { %1134 = vst [vmem:[#allocation3 + $0x8] sm:$0xf] %v2608_v7  ;;  %v1057_v53 = vmax.f32 %v1041_v2, 0.0  ;;  %v1044_v28 = vadd.f32 %v3614_v50, %v1021_v45  ;;  %v1019_v44 = vadd.f32 %v970_v9, %v769_v46  ;;  %v785_v46 = vadd.f32 %v3609_v6, %v3593_v33 }
 0x148   :  { %v2912_v48 = vpop.f32.mrf.mxu0  ;;  %v3689_v52 = vadd.f32 %v800_v27, %v3607_v37 }
 0x149   :  { %v2611_v47 = vpack.c.bf16 %v1057_v53, %v1057_v53  ;;  %v1060_v62 = vmax.f32 %v1044_v28, 0.0  ;;  %v1042_v20 = vadd.f32 %v3614_v50, %v1019_v44  ;;  %v1024_v51 = vadd.f32 %v2912_v48, %v790_v34 }
 0x14a   :  { %v983_v1 = vpop.f32.mrf.mxu0  ;;  %v3684_v7 = vld [vmem:[#allocation3 + $0x4] sm:$0xf]  ;;  %v809_v53 = vadd.f32 %v2885_v0, %v3603_v61  ;;  %v4061_v61 = vrot.slane %v3616_v16, 11 }
 0x14b   :  { %1137 = vst [vmem:[#allocation3 + $0x1c] sm:$0xf] %v2611_v47  ;;  %v2647_v2 = vpack.c.bf16 %v1060_v62, %v1059_v35  ;;  %v1058_v45 = vmax.f32 %v1042_v20, 0.0  ;;  %v1047_v9 = vadd.f32 %v3614_v50, %v1024_v51  ;;  %v1022_v34 = vadd.f32 %v983_v1, %v782_v10 }
 0x14c   :  { %v2913_v33 = vpop.f32.mrf.mxu0  ;;  %v1199_v36 = vrot.slane %v3684_v7, 7  ;;  %v3692_v57 = vld [vmem:[#allocation3 + $0x10] sm:$0xf]  ;;  %v1154_v15 = vld [vmem:[#allocation3 + $0x14] sm:$0x7]  ;;  %v1283_v6 = vshrl.u32 %v3684_v7, 16 }
 0x14d   :  { %2700 = vst [vmem:[#allocation3 + $0x28] sm:$0xff] %v2647_v2   ;;  %v2612_v30 = vpack.c.bf16 %v1058_v45, %v1058_v45  ;;  %v1063_v4 = vmax.f32 %v1047_v9, 0.0  ;;  %v1045_v20 = vadd.f32 %v3614_v50, %v1022_v34  ;;  %v1025_v47 = vadd.f32 %v2913_v33, %v793_v58 }
 0x14e   :  { %v986_v62 = vpop.f32.mrf.mxu0  ;;  %v1151_v28 = vld [vmem:[#allocation3 + $0x8] sm:$0x7]  ;;  %v1200_v37 = vsel %vm3379_vm4, %v4061_v61, %v1199_v36  ;;  %v1201_v0 = vrot.slane %v1199_v36, 4  ;;  %v1206_v44 = vrot.slane %v3692_v57, 7  ;;  %v1209_v10 = vrot.slane %v1154_v15, 7 }
 0x14f   :  { %1138 = vst [vmem:[#allocation3 + $0x20] sm:$0xf] %v2612_v30  ;;  %v1061_v35 = vmax.f32 %v1045_v20, 0.0  ;;  %v1048_v48 = vadd.f32 %v3614_v50, %v1025_v47  ;;  %v1023_v27 = vadd.f32 %v986_v62, %v785_v46  ;;  %v1202_v51 = vrot.slane %v1151_v28, 7  ;;  %v3708_v30 = vld [vmem:[#allocation3 + $0x8] sm:$0xf] }
 0x150   :  { %v2916_v1 = vpop.f32.mrf.mxu0  ;;  %v4062_v58 = vrot.slane %v3618_v19, 11  ;;  %v1208_v16 = vrot.slane %v1206_v44, 4  ;;  %v1285_v45 = vrot.slane %v1283_v6, 7  ;;  %v1286_v9 = vshll.u32 %v3684_v7, 16 }
 0x151   :  { %v2615_v34 = vpack.c.bf16 %v1061_v35, %v1061_v35  ;;  %v1064_v33 = vmax.f32 %v1048_v48, 0.0  ;;  %v1046_v36 = vadd.f32 %v3614_v50, %v1023_v27  ;;  %v1028_v15 = vadd.f32 %v2916_v1, %v806_v55 }
 0x152   :  { %v1207_v2 = vsel %vm3379_vm4, %v4062_v58, %v1206_v44  ;;  %v999_v20 = vpop.f32.mrf.mxu0  ;;  %v1203_v46 = vsel %vm3379_vm4, %v1201_v0, %v1202_v51  ;;  %v1210_v19 = vsel %vm3379_vm4, %v1208_v16, %v1209_v10  ;;  %v1288_v47 = vor.u32 %v1286_v9, %v1285_v45  ;;  %v3719_v51 = vld [vmem:[#allocation3 + $0x14] sm:$0xf]  ;;  %v3722_v16 = vld [vmem:[#allocation3 + $0x1c] sm:$0xf] }
 0x153   :  { %v1290_v62 = vrot.slane %v1285_v45, 4  ;;  %1141 = vst [vmem:[#allocation3 + $0x34] sm:$0xf] %v2615_v34  ;;  %v2652_v6 = vpack.c.bf16 %v1064_v33, %v1063_v4  ;;  %v1062_v28 = vmax.f32 %v1046_v36, 0.0  ;;  %v1051_v61 = vadd.f32 %v3614_v50, %v1028_v15 }
 0x154   :  { %v1026_v44 = vadd.f32 %v999_v20, %v798_v60  ;;  %v2917_v35 = vpop.f32.mrf.mxu0  ;;  %v2541_v48 = vcombine.low %v1200_v37, %v1203_v46  ;;  %v2542_v55 = vcombine.low %v1207_v2, %v1210_v19  ;;  %v1289_v27 = vsel %vm3394_vm5, %v3630_v63, %v1288_v47  ;;  %v3724_v60 = vld [vmem:[#allocation10 + $0x30] sm:$0xff]   ;;  %v3735_v47 = vld [vmem:[#allocation10 + $0x28] sm:$0xff]  }
 0x155   :  { %v1292_v0 = vshrl.u32 %v3708_v30, 16  ;;  %2701 = vst [vmem:[#allocation3 + $0x40] sm:$0xff] %v2652_v6   ;;  %v2616_v10 = vpack.c.bf16 %v1062_v28, %v1062_v28  ;;  %v1067_v1 = vmax.f32 %v1051_v61, 0.0  ;;  %v1029_v58 = vadd.f32 %v2917_v35, %v809_v53 }
 0x156   :  { %v1049_v4 = vadd.f32 %v3614_v50, %v1026_v44  ;;  %2966 = vmatprep.mubr.bf16.mxu0 %v2541_v48  ;;  %v1002_v37 = vpop.f32.mrf.mxu0  ;;  %v1295_v45 = vshll.u32 %v3708_v30, 16  ;;  %v1305_v63 = vshrl.u32 %v3692_v57, 16  ;;  %v1308_v9 = vshll.u32 %v3692_v57, 16  ;;  %v1157_v35 = vld [vmem:[#allocation3 + $0x20] sm:$0x7] }
 0x157   :  { %v1294_v2 = vrot.slane %v1292_v0, 7  ;;  %1142 = vst [vmem:[#allocation3 + $0x38] sm:$0xf] %v2616_v10  ;;  %v1052_v33 = vadd.f32 %v3614_v50, %v1029_v58  ;;  %2967 = vmatmul.mubr.bf16.vlgmr.msra.gmra.mxu0 %v2542_v55  ;;  %v1027_v53 = vadd.f32 %v1002_v37, %v3689_v52  ;;  %v1314_v36 = vshrl.u32 %v3719_v51, 16  ;;  %v3738_v48 = vld [vmem:[#allocation3 + $0x28] sm:$0xf] }
 0x158   :  { %v1065_v34 = vmax.f32 %v1049_v4, 0.0  ;;  %v1307_v20 = vrot.slane %v1305_v63, 7  ;;  %v1317_v46 = vshll.u32 %v3719_v51, 16  ;;  %v1213_v19 = vrot.slane %v3722_v16, 7  ;;  %3015 = vmatpush3.bf16.msra.mxu0 %v3578_v3  ;;  %v1160_v58 = vld [vmem:[#allocation3 + $0x2c] sm:$0x7] }
 0x159   :  { %v1297_v15 = vor.u32 %v1295_v45, %v1294_v2  ;;  %v1068_v28 = vmax.f32 %v1052_v33, 0.0  ;;  %v1050_v61 = vadd.f32 %v3614_v50, %v1027_v53  ;;  %v1316_v44 = vrot.slane %v1314_v36, 7  ;;  %3016 = vmatprep.subr.bf16.mxu0 %v3724_v60  ;;  %v3118_v53 = vld [vmem:[#allocation9 + $0xb0] sm:$0xff]  }
 0x15a   :  { %v2619_v6 = vpack.c.bf16 %v1065_v34, %v1065_v34  ;;  %v1310_v55 = vor.u32 %v1308_v9, %v1307_v20  ;;  %v1312_v0 = vrot.slane %v1307_v20, 4  ;;  %v4063_v10 = vrot.slane %v3627_v14, 11  ;;  %v3751_v9 = vld [vmem:[#allocation3 + $0x20] sm:$0xf] }
 0x15b   :  { %v1298_v52 = vsel %vm3394_vm5, %v1290_v62, %v1297_v15  ;;  %v2657_v37 = vpack.c.bf16 %v1068_v28, %v1067_v1  ;;  %v1066_v50 = vmax.f32 %v1050_v61, 0.0  ;;  %v1319_v45 = vor.u32 %v1317_v46, %v1316_v44  ;;  %v3766_v28 = vld [vmem:[#allocation3 + $0x34] sm:$0xf]  ;;  %v3768_v61 = vld [vmem:[#allocation10 + $0x20] sm:$0xff]  }
 0x15c   :  { %v1214_v4 = vsel %vm3379_vm4, %v4063_v10, %v1213_v19  ;;  %1145 = vst [vmem:[#allocation3 + $0x4c] sm:$0xf] %v2619_v6  ;;  %v2525_v2 = vcombine.low %v1289_v27, %v1298_v52  ;;  %v1311_v63 = vsel %vm3394_vm5, %v3632_v11, %v1310_v55  ;;  %v1215_v34 = vrot.slane %v1213_v19, 4  ;;  %3017 = vmatpush3.bf16.msra.mxu0 %v3724_v60  ;;  %v3764_v6 = vld [vmem:[#allocation3 + $0x2c] sm:$0xf] }
 0x15d   :  { %v1216_v33 = vrot.slane %v1157_v35, 7  ;;  %v1220_v62 = vrot.slane %v3738_v48, 7  ;;  %2702 = vst [vmem:[#allocation3 + $0x58] sm:$0xff] %v2657_v37   ;;  %v2620_v14 = vpack.c.bf16 %v1066_v50, %v1066_v50  ;;  %v1320_v1 = vsel %vm3394_vm5, %v1312_v0, %v1319_v45  ;;  %3018 = vmatprep.subr.bf16.mxu0 %v3735_v47  ;;  %v3772_v0 = vld [vmem:[#allocation3 + $0x40] sm:$0xf] }
 0x15e   :  { %2934 = vmatprep.mubr.bf16.mxu1 %v2525_v2  ;;  %v1223_v27 = vrot.slane %v1160_v58, 7  ;;  %v1327_v36 = vshrl.u32 %v3722_v16, 16  ;;  %v2526_v11 = vcombine.low %v1311_v63, %v1320_v1  ;;  %v4064_v20 = vrot.slane %v3636_v56, 11  ;;  %v1163_v50 = vld [vmem:[#allocation3 + $0x38] sm:$0x7]  ;;  %v3120_v1 = vld [vmem:[#allocation9 + $0xa8] sm:$0xff]  }
 0x15f   :  { %v1217_v15 = vsel %vm3379_vm4, %v1215_v34, %v1216_v33  ;;  %v1222_v19 = vrot.slane %v1220_v62, 4  ;;  %1146 = vst [vmem:[#allocation3 + $0x50] sm:$0xf] %v2620_v14  ;;  %v1330_v52 = vshll.u32 %v3722_v16, 16  ;;  %v1336_v55 = vshrl.u32 %v3751_v9, 16  ;;  %v3781_v34 = vld [vmem:[#allocation10 + $0x18] sm:$0xff]  }
 0x160   :  { %v1221_v46 = vsel %vm3379_vm4, %v4064_v20, %v1220_v62  ;;  %v2543_v44 = vcombine.low %v1214_v4, %v1217_v15  ;;  %v1329_v35 = vrot.slane %v1327_v36, 7  ;;  %2935 = vmatmul.mubr.bf16.vlgmr.msra.gmra.mxu1 %v2526_v11  ;;  %v1339_v10 = vshll.u32 %v3751_v9, 16  ;;  %3019 = vmatpush3.bf16.msra.mxu0 %v3735_v47  ;;  %v1166_v15 = vld [vmem:[#allocation3 + $0x44] sm:$0x7] }
 0x161   :  { %v1224_v56 = vsel %vm3379_vm4, %v1222_v19, %v1223_v27  ;;  %v1349_v58 = vshrl.u32 %v3738_v48, 16  ;;  %v1352_v37 = vshll.u32 %v3738_v48, 16  ;;  %2983 = vmatpush3.bf16.msra.mxu1 %v3575_v59  ;;  %v1338_v63 = vrot.slane %v1336_v55, 7  ;;  %3020 = vmatprep.subr.bf16.mxu0 %v3768_v61  ;;  %v3795_v55 = vld [vmem:[#allocation3 + $0x38] sm:$0xf] }
 0x162   :  { %2970 = vmatprep.mubr.bf16.mxu0 %v2543_v44  ;;  %v2544_v4 = vcombine.low %v1221_v46, %v1224_v56  ;;  %v1332_v2 = vor.u32 %v1330_v52, %v1329_v35  ;;  %v1334_v45 = vrot.slane %v1329_v35, 4  ;;  %2984 = vmatprep.subr.bf16.mxu1 %v3118_v53  ;;  %v1358_v62 = vshrl.u32 %v3764_v6, 16 }
 0x163   :  { %v1351_v33 = vrot.slane %v1349_v58, 7  ;;  %v1361_v14 = vshll.u32 %v3764_v6, 16  ;;  %v1227_v27 = vrot.slane %v3766_v28, 7  ;;  %v1341_v36 = vor.u32 %v1339_v10, %v1338_v63 }
 0x164   :  { %2971 = vmatmul.mubr.bf16.gmra.mxu0 %v2544_v4  ;;  %v1333_v59 = vsel %vm3394_vm5, %v3646_v25, %v1332_v2  ;;  %v1230_v11 = vrot.slane %v1163_v50, 7  ;;  %v1234_v20 = vrot.slane %v3772_v0, 7  ;;  %v1360_v44 = vrot.slane %v1358_v62, 7 }
 0x165   :  { %v1354_v46 = vor.u32 %v1352_v37, %v1351_v33  ;;  %v1356_v19 = vrot.slane %v1351_v33, 4  ;;  %v4065_v35 = vrot.slane %v3641_v40, 11  ;;  %3021 = vmatpush3.bf16.msra.mxu0 %v3768_v61  ;;  %2985 = vmatpush3.bf16.msra.mxu1 %v3118_v53  ;;  %v1342_v25 = vsel %vm3394_vm5, %v1334_v45, %v1341_v36  ;;  %v3805_v40 = vld [vmem:[#allocation10 + $0x10] sm:$0xff]   ;;  %v3122_v45 = vld [vmem:[#allocation9 + $0xa0] sm:$0xff]  }
 0x166   :  { %v1229_v56 = vrot.slane %v1227_v27, 4  ;;  %v4066_v10 = vrot.slane %v3643_v41, 11  ;;  %v1236_v37 = vrot.slane %v1234_v20, 4  ;;  %3022 = vmatprep.subr.bf16.mxu0 %v3781_v34  ;;  %v2527_v50 = vcombine.low %v1333_v59, %v1342_v25  ;;  %2986 = vmatprep.subr.bf16.mxu1 %v3120_v1  ;;  %v1169_v25 = vld [vmem:[#allocation3 + $0x50] sm:$0x7] }
 0x167   :  { %v1228_v52 = vsel %vm3379_vm4, %v4065_v35, %v1227_v27  ;;  %v1355_v4 = vsel %vm3394_vm5, %v3656_v49, %v1354_v46  ;;  %v1363_v53 = vor.u32 %v1361_v14, %v1360_v44  ;;  %v1237_v2 = vrot.slane %v1166_v15, 7  ;;  %v3815_v27 = vld [vmem:[#allocation3 + $0x44] sm:$0xf]  ;;  %v3822_v15 = vld [vmem:[#allocation3 + $0x4c] sm:$0xf] }
 0x168   :  { %v1235_v58 = vsel %vm3379_vm4, %v4066_v10, %v1234_v20  ;;  %v1231_v41 = vsel %vm3379_vm4, %v1229_v56, %v1230_v11  ;;  %v1371_v63 = vshrl.u32 %v3766_v28, 16  ;;  %v1374_v33 = vshll.u32 %v3766_v28, 16  ;;  %2938 = vmatprep.mubr.bf16.mxu1 %v2527_v50  ;;  %v3825_v11 = vld [vmem:[#allocation10 + $0x8] sm:$0xff]   ;;  %v3827_v56 = vld [vmem:[#allocation3 + $0x58] sm:$0xf] }
 0x169   :  { %v1380_v62 = vshrl.u32 %v3795_v55, 16  ;;  %v1364_v59 = vsel %vm3394_vm5, %v1356_v19, %v1363_v53  ;;  %v2545_v49 = vcombine.low %v1228_v52, %v1231_v41  ;;  %v1238_v14 = vsel %vm3379_vm4, %v1236_v37, %v1237_v2  ;;  %3023 = vmatpush3.bf16.msra.mxu0 %v3781_v34  ;;  %2987 = vmatpush3.bf16.msra.mxu1 %v3120_v1  ;;  %v3124_v50 = vld [vmem:[#allocation9 + $0x98] sm:$0xff]  }
 0x16a   :  { %v1383_v36 = vshll.u32 %v3795_v55, 16  ;;  %v2528_v20 = vcombine.low %v1355_v4, %v1364_v59  ;;  %v2546_v46 = vcombine.low %v1235_v58, %v1238_v14  ;;  %v1373_v44 = vrot.slane %v1371_v63, 7  ;;  %3024 = vmatprep.subr.bf16.mxu0 %v3805_v40  ;;  %2988 = vmatprep.subr.bf16.mxu1 %v3122_v45 }
 0x16b   :  { %v1382_v35 = vrot.slane %v1380_v62, 7  ;;  %2974 = vmatprep.mubr.bf16.mxu0 %v2545_v49  ;;  %v1393_v19 = vshrl.u32 %v3772_v0, 16  ;;  %v1396_v52 = vshll.u32 %v3772_v0, 16  ;;  %v1402_v10 = vshrl.u32 %v3815_v27, 16  ;;  %v1172_v62 = vld [vmem:[#allocation3 + $0x5c] sm:$0x7] }
 0x16c   :  { %v1405_v37 = vshll.u32 %v3815_v27, 16  ;;  %2939 = vmatmul.mubr.bf16.gmra.mxu1 %v2528_v20  ;;  %2975 = vmatmul.mubr.bf16.gmra.mxu0 %v2546_v46  ;;  %v1376_v1 = vor.u32 %v1374_v33, %v1373_v44  ;;  %v1378_v58 = vrot.slane %v1373_v44, 4  ;;  %v1241_v53 = vrot.slane %v3822_v15, 7 }
 0x16d   :  { %v1385_v4 = vor.u32 %v1383_v36, %v1382_v35  ;;  %v1395_v2 = vrot.slane %v1393_v19, 7  ;;  %v1404_v41 = vrot.slane %v1402_v10, 7  ;;  %v1244_v63 = vrot.slane %v1169_v25, 7  ;;  %3025 = vmatpush3.bf16.msra.mxu0 %v3805_v40  ;;  %2989 = vmatpush3.bf16.msra.mxu1 %v3122_v45  ;;  %v3843_v36 = vld [vmem:[#allocation10] sm:$0xff]   ;;  %v3126_v45 = vld [vmem:[#allocation9 + $0x90] sm:$0xff]  }
 0x16e   :  { %v1248_v59 = vrot.slane %v3827_v56, 7  ;;  %v1377_v49 = vsel %vm3394_vm5, %v3663_v38, %v1376_v1  ;;  %v1243_v14 = vrot.slane %v1241_v53, 4  ;;  %3026 = vmatprep.subr.bf16.mxu0 %v3825_v11  ;;  %v2575_v20 = vcombine.low %v3329_v12, %v3331_v13  ;;  %2990 = vmatprep.subr.bf16.mxu1 %v3124_v50  ;;  %v3847_v19 = vld [vmem:[#allocation3 + $0x50] sm:$0xf] }
 0x16f   :  { %v1386_v33 = vsel %vm3394_vm5, %v1378_v58, %v1385_v4  ;;  %v1398_v44 = vor.u32 %v1396_v52, %v1395_v2  ;;  %v1400_v35 = vrot.slane %v1395_v2, 4  ;;  %v1407_v25 = vor.u32 %v1405_v37, %v1404_v41  ;;  %v3861_v2 = vld [vmem:[#allocation3 + $0x5c] sm:$0xf] }
 0x170   :  { %v2529_v46 = vcombine.low %v1377_v49, %v1386_v33  ;;  %v4067_v38 = vrot.slane %v3651_v5, 11  ;;  %v1245_v1 = vsel %vm3379_vm4, %v1243_v14, %v1244_v63  ;;  %v1250_v58 = vrot.slane %v1248_v59, 4 }
 0x171   :  { %v1251_v4 = vrot.slane %v1172_v62, 7  ;;  %v1399_v12 = vsel %vm3394_vm5, %v3665_v8, %v1398_v44  ;;  %v1408_v13 = vsel %vm3394_vm5, %v1400_v35, %v1407_v25  ;;  %v1415_v37 = vshrl.u32 %v3822_v15, 16  ;;  %3027 = vmatpush3.bf16.msra.mxu0 %v3825_v11  ;;  %2991 = vmatpush3.bf16.msra.mxu1 %v3124_v50 }
 0x172   :  { %v1242_v10 = vsel %vm3379_vm4, %v4067_v38, %v1241_v53  ;;  %2942 = vmatprep.mubr.bf16.mxu1 %v2529_v46  ;;  %v2530_v53 = vcombine.low %v1399_v12, %v1408_v13  ;;  %v4068_v41 = vrot.slane %v3653_v29, 11  ;;  %v1424_v62 = vshrl.u32 %v3847_v19, 16  ;;  %3028 = vmatprep.subr.bf16.mxu0 %v3843_v36  ;;  %v3128_v46 = vld [vmem:[#allocation9 + $0x88] sm:$0xff]  }
 0x173   :  { %v2547_v52 = vcombine.low %v1242_v10, %v1245_v1  ;;  %v1252_v8 = vsel %vm3379_vm4, %v1250_v58, %v1251_v4  ;;  %2992 = vmatprep.subr.bf16.mxu1 %v3126_v45  ;;  %v1417_v33 = vrot.slane %v1415_v37, 7  ;;  %v1418_v14 = vshll.u32 %v3822_v15, 16 }
 0x174   :  { %v1249_v63 = vsel %vm3379_vm4, %v4068_v41, %v1248_v59  ;;  %v1437_v50 = vshrl.u32 %v3827_v56, 16  ;;  %2943 = vmatmul.mubr.bf16.gmra.mxu1 %v2530_v53  ;;  %v2523_v59 = vrot.slane %v1410_v24, 11  ;;  %v1426_v44 = vrot.slane %v1424_v62, 7 }
 0x175   :  { %2978 = vmatprep.mubr.bf16.mxu0 %v2547_v52  ;;  %v2548_v49 = vcombine.low %v1249_v63, %v1252_v8  ;;  %v1427_v43 = vshll.u32 %v3847_v19, 16  ;;  %v1446_v35 = vshrl.u32 %v3861_v2, 16  ;;  %v1420_v25 = vor.u32 %v1418_v14, %v1417_v33  ;;  %2993 = vmatpush3.bf16.msra.mxu1 %v3126_v45  ;;  %v3131_v52 = vld [vmem:[#allocation9 + $0x80] sm:$0xff]  }
 0x176   :  { %v2524_v38 = vrot.slane %v1432_v39, 11  ;;  %v1439_v10 = vrot.slane %v1437_v50, 7  ;;  %v1440_v1 = vshll.u32 %v3827_v56, 16  ;;  %v1422_v58 = vrot.slane %v1417_v33, 4  ;;  %3029 = vmatpush3.bf16.msra.mxu0 %v3843_v36  ;;  %2994 = vmatprep.subr.bf16.mxu1 %v3128_v46 }
 0x177   :  { %2979 = vmatmul.mubr.bf16.gmra.mxu0 %v2548_v49  ;;  %v1429_v4 = vor.u32 %v1427_v43, %v1426_v44  ;;  %v1448_v12 = vrot.slane %v1446_v35, 7  ;;  %v1449_v5 = vshll.u32 %v3861_v2, 16  ;;  %v1421_v29 = vsel %vm3394_vm5, %v2523_v59, %v1420_v25 }
 0x178   :  { %v1442_v24 = vor.u32 %v1440_v1, %v1439_v10  ;;  %v1444_v13 = vrot.slane %v1439_v10, 4  ;;  %3030 = vmatprep.mubr.bf16.mxu0 %v2575_v20  ;;  %v2576_v41 = vcombine.low %v3338_v17, %v3340_v18  ;;  %v2577_v8 = vcombine.low %v3347_v23, %v3352_v26 }
 0x179   :  { %v1430_v39 = vsel %vm3394_vm5, %v1422_v58, %v1429_v4  ;;  %v1451_v37 = vor.u32 %v1449_v5, %v1448_v12  ;;  %2995 = vmatpush3.bf16.msra.mxu1 %v3128_v46  ;;  %v2557_v62 = vcombine.low %v3684_v7, %v3708_v30  ;;  %v2578_v17 = vcombine.low %v3361_v31, %v3363_v32 }
 0x17a   :  { %v2531_v45 = vcombine.low %v1421_v29, %v1430_v39  ;;  %v1443_v53 = vsel %vm3394_vm5, %v2524_v38, %v1442_v24  ;;  %2996 = vmatprep.subr.bf16.mxu1 %v3131_v52  ;;  %v2558_v18 = vcombine.low %v3692_v57, %v3719_v51  ;;  %v2559_v54 = vcombine.low %v3722_v16, %v3751_v9  ;;  %v4069_v57 = vld [vmem:[#allocation17_spill] sm:$0xff]  ;;  %v4070_v51 = vld [vmem:[#allocation19_spill] sm:$0xff]  ;;  %v4071_v16 = vld [vmem:[#allocation18_spill] sm:$0xff] }
 0x17b   :  { %v1452_v63 = vsel %vm3394_vm5, %v1444_v13, %v1451_v37  ;;  %v2560_v23 = vcombine.low %v3738_v48, %v3764_v6  ;;  %v2561_v26 = vcombine.low %v3766_v28, %v3795_v55  ;;  %v2562_v31 = vcombine.low %v3772_v0, %v3815_v27  ;;  %v3976_v39 = vld [vmem:[%s4043_s4] ss:$0 sm:$0xff]  ;;  %s3264_s4 = smov [#allocation12]  }
 0x17c   :  { %2946 = vmatprep.mubr.bf16.mxu1 %v2531_v45  ;;  %v2532_v20 = vcombine.low %v1443_v53, %v1452_v63  ;;  %v2563_v32 = vcombine.low %v3822_v15, %v3847_v19  ;;  %v2564_v7 = vcombine.low %v3827_v56, %v3861_v2  ;;  %v2580_v30 = vcombine.low %v4069_v57, %v3439_v42  ;;  %v3981_v53 = vld [vmem:[%s4045_s6] ss:$0 sm:$0xff]  ;;  %s2414_s6 = sshll.u32 %s3264_s4, 4  ;;  %s2415_s6 = int_to_ptr.vmem [resolvable:$true] %s2414_s6 }
 0x17d   :  { %2997 = vmatpush3.bf16.msra.mxu1 %v3131_v52  ;;  %s3229_s24 = scalar_lea.vmem %s2415_s6, 1024  ;;  %p3234_p7 = scmp.lt.s32.totalorder %s2415_s6, %s2415_s6 }
 0x17e   :  { %2947 = vmatmul.mubr.bf16.gmra.mxu1 %v2532_v20  ;;  %3046 = vmatprep.subr.bf16.mxu1 %v3578_v3  ;;  %p3230_p6 = scmp.ne.s32.totalorder %s2415_s6, %s3229_s24  ;;  %p3235_p8 = scmp.lt.s32.totalorder %s3229_s24, %s3229_s24 }
 0x17f   :  { %3031 = vmatmul.mubr.bf16.vlgmr.msra.gmra.mxu0 %v2576_v41  ;;  %2998 = vmatprep.mubr.bf16.mxu1 %v2557_v62 }
 0x180   :  { %3034 = vmatprep.mubr.bf16.mxu0 %v2577_v8  ;;  %p3236_p9 = por %p3235_p8, %p3234_p7 }
 0x182   :  { %p3237_p10 = pnand %p3236_p9, %p3230_p6 }
 0x186   :  { %2999 = vmatmul.mubr.bf16.vlgmr.msra.gmra.mxu1 %v2558_v18 }
 0x187   :  { %3035 = vmatmul.mubr.bf16.gmra.mxu0 %v2578_v17  ;;  %3002 = vmatprep.mubr.bf16.mxu1 %v2559_v54 }
 0x188   :  { %3054 = vmatpush3.bf16.msra.mxu1 %v3578_v3  ;;  %v2579_v3 = vcombine.low %v3419_v21, %v3421_v22  ;;  %v4072_v21 = vld [vmem:[#allocation21_spill] sm:$0xff]  ;;  %v4073_v22 = vld [vmem:[#allocation20_spill] sm:$0xff] }
 0x189   :  { %3047 = vmatprep.subr.bf16.mxu1 %v3724_v60 }
 0x18c   :  { %3055 = vmatpush3.bf16.msra.mxu1 %v3724_v60  ;;  %v2581_v60 = vcombine.low %v4071_v16, %v4070_v51 }
 0x18d   :  { %3048 = vmatprep.subr.bf16.mxu1 %v3735_v47 }
 0x18e   :  { %3003 = vmatmul.mubr.bf16.gmra.mxu1 %v2560_v23 }
 0x18f   :  { %3006 = vmatprep.mubr.bf16.mxu1 %v2561_v26 }
 0x190   :  { %3056 = vmatpush3.bf16.msra.mxu1 %v3735_v47  ;;  %v2582_v47 = vcombine.low %v4073_v22, %v4072_v21 }
 0x191   :  { %3049 = vmatprep.subr.bf16.mxu1 %v3768_v61 }
 0x194   :  { %3057 = vmatpush3.bf16.msra.mxu1 %v3768_v61 }
 0x195   :  { %3050 = vmatprep.subr.bf16.mxu1 %v3781_v34 }
 0x196   :  { %3007 = vmatmul.mubr.bf16.gmra.mxu1 %v2562_v31 }
 0x197   :  { %3010 = vmatprep.mubr.bf16.mxu1 %v2563_v32 }
 0x198   :  { %3058 = vmatpush3.bf16.msra.mxu1 %v3781_v34 }
 0x199   :  { %3051 = vmatprep.subr.bf16.mxu1 %v3805_v40 }
 0x19c   :  { %3059 = vmatpush3.bf16.msra.mxu1 %v3805_v40 }
 0x19d   :  { %3052 = vmatprep.subr.bf16.mxu1 %v3825_v11 }
 0x19e   :  { %3011 = vmatmul.mubr.bf16.gmra.mxu1 %v2564_v7 }
 0x19f   :  { %3038 = vmatprep.mubr.bf16.mxu1 %v2579_v3 }
 0x1a0   :  { %3060 = vmatpush3.bf16.msra.mxu1 %v3825_v11 }
 0x1a1   :  { %3053 = vmatprep.subr.bf16.mxu1 %v3843_v36 }
 0x1a4   :  { %3061 = vmatpush3.bf16.msra.mxu1 %v3843_v36 }
 0x1a7   :  { %3039 = vmatmul.mubr.bf16.vlgmr.msra.gmra.mxu1 %v2580_v30 }
 0x1a8   :  { %3042 = vmatprep.mubr.bf16.mxu1 %v2581_v60 }
 0x1af   :  { %3043 = vmatmul.mubr.bf16.gmra.mxu1 %v2582_v47 }
 0x217   :  { %v2968_v48 = vpop.f32.mrf.mxu0 }
 0x219   :  { %v1761_v9 = vpop.f32.mrf.mxu0 }
 0x21b   :  { %v2969_v6 = vpop.f32.mrf.mxu0 }
 0x21d   :  { %v1764_v28 = vpop.f32.mrf.mxu0 }
 0x220   :  { %v2936_v61 = vpop.f32.mrf.mxu1 }
 0x221   :  { %v1770_v13 = vadd.f32 %v2968_v48, %v2936_v61 }
 0x222   :  { %v1584_v0 = vpop.f32.mrf.mxu1 }
 0x223   :  { %v1762_v37 = vadd.f32 %v1761_v9, %v1584_v0 }
 0x224   :  { %v2972_v34 = vpop.f32.mrf.mxu0  ;;  %v2937_v55 = vpop.f32.mrf.mxu1 }
 0x225   :  { %v1773_v63 = vadd.f32 %v2969_v6, %v2937_v55 }
 0x226   :  { %v1777_v42 = vpop.f32.mrf.mxu0  ;;  %v1587_v40 = vpop.f32.mrf.mxu1 }
 0x227   :  { %v1765_v54 = vadd.f32 %v1764_v28, %v1587_v40 }
 0x228   :  { %v2973_v27 = vpop.f32.mrf.mxu0 }
 0x22a   :  { %v3937_v15 = vpop.f32.mrf.mxu0 }
 0x22c   :  { %v2940_v11 = vpop.f32.mrf.mxu1  ;;  %v3939_v56 = vpop.f32.mrf.mxu0 }
 0x22d   :  { %v1786_v60 = vadd.f32 %v2972_v34, %v2940_v11 }
 0x22e   :  { %v1600_v36 = vpop.f32.mrf.mxu1  ;;  %v3941_v19 = vpop.f32.mrf.mxu0 }
 0x22f   :  { %v1778_v47 = vadd.f32 %v1777_v42, %v1600_v36 }
 0x230   :  { %v2941_v2 = vpop.f32.mrf.mxu1  ;;  %v3943_v49 = vpop.f32.mrf.mxu0 }
 0x231   :  { %v1789_v28 = vadd.f32 %v2973_v27, %v2941_v2 }
 0x232   :  { %v3945_v33 = vpop.f32.mrf.mxu1  ;;  %v3947_v14 = vpop.f32.mrf.mxu0 }
 0x233   :  { %v1781_v27 = vadd.f32 %v3937_v15, %v3945_v33 }
 0x234   :  { %v3949_v50 = vpop.f32.mrf.mxu1 }
 0x236   :  { %v3953_v59 = vpop.f32.mrf.mxu1 }
 0x237   :  { %v3951_v46 = vpop.f32.mrf.mxu0 }
 0x238   :  { %v3957_v43 = vpop.f32.mrf.mxu1 }
 0x239   :  { %v3955_v44 = vpop.f32.mrf.mxu0 }
 0x23a   :  { %v3961_v25 = vpop.f32.mrf.mxu1 }
 0x23b   :  { %v3959_v35 = vpop.f32.mrf.mxu0 }
 0x23d   :  { %v3963_v38 = vpop.f32.mrf.mxu0 }
 0x23e   :  { %v3965_v10 = vpop.f32.mrf.mxu1 }
 0x23f   :  { %v3032_v1 = vpop.f32.mrf.mxu0 }
 0x240   :  { %v3967_v58 = vpop.f32.mrf.mxu1  ;;  %v2243_v18 = vadd.f32 %v3032_v1, %v3981_v53 }
 0x241   :  { %v2234_v4 = vpop.f32.mrf.mxu0 }
 0x242   :  { %v3969_v12 = vpop.f32.mrf.mxu1  ;;  %v2235_v3 = vadd.f32 %v3981_v53, %v2234_v4 }
 0x243   :  { %v3033_v5 = vpop.f32.mrf.mxu0 }
 0x244   :  { %v3971_v24 = vpop.f32.mrf.mxu1  ;;  %v2246_v51 = vadd.f32 %v3033_v5, %v3981_v53 }
 0x245   :  { %v2237_v52 = vpop.f32.mrf.mxu0 }
 0x246   :  { %v3000_v29 = vpop.f32.mrf.mxu1  ;;  %v2238_v6 = vadd.f32 %v3981_v53, %v2237_v52 }
 0x247   :  { %v2028_v45 = vadd.f32 %v3000_v29, %v1770_v13  ;;  %v3036_v62 = vpop.f32.mrf.mxu0 }
 0x248   :  { %v1963_v41 = vpop.f32.mrf.mxu1  ;;  %v2259_v11 = vadd.f32 %v3036_v62, %v3981_v53 }
 0x249   :  { %v2051_v20 = vadd.f32 %v3976_v39, %v2028_v45  ;;  %v2026_v8 = vadd.f32 %v1963_v41, %v1762_v37  ;;  %v2250_v16 = vpop.f32.mrf.mxu0 }
 0x24a   :  { %v3001_v17 = vpop.f32.mrf.mxu1 }
 0x24b   :  { %v2067_v23 = vmax.f32 %v2051_v20, 0.0  ;;  %v2049_v26 = vadd.f32 %v3976_v39, %v2026_v8  ;;  %v2029_v31 = vadd.f32 %v3001_v17, %v1773_v63  ;;  %v3037_v13 = vpop.f32.mrf.mxu0 }
 0x24c   :  { %v1966_v32 = vpop.f32.mrf.mxu1  ;;  %v2262_v41 = vadd.f32 %v3037_v13, %v3981_v53 }
 0x24d   :  { %v2065_v7 = vmax.f32 %v2049_v26, 0.0  ;;  %v2052_v57 = vadd.f32 %v3976_v39, %v2029_v31  ;;  %v2027_v30 = vadd.f32 %v1966_v32, %v1765_v54  ;;  %v2299_v21 = vadd.f32 %v2243_v18, %v2067_v23  ;;  %v2253_v18 = vpop.f32.mrf.mxu0 }
 0x24e   :  { %v3004_v22 = vpop.f32.mrf.mxu1  ;;  %v2251_v23 = vadd.f32 %v3981_v53, %v2250_v16 }
 0x24f   :  { %v2068_v48 = vmax.f32 %v2052_v57, 0.0  ;;  %v2050_v9 = vadd.f32 %v3976_v39, %v2027_v30  ;;  %v2032_v61 = vadd.f32 %v3004_v22, %v1786_v60  ;;  %v2297_v40 = vadd.f32 %v2235_v3, %v2065_v7 }
 0x250   :  { %v1979_v0 = vpop.f32.mrf.mxu1  ;;  %v2315_v29 = vmax.f32 %v2299_v21, 0.0  ;;  %v2254_v7 = vadd.f32 %v3981_v53, %v2253_v18 }
 0x251   :  { %v2066_v55 = vmax.f32 %v2050_v9, 0.0  ;;  %v2300_v1 = vadd.f32 %v2246_v51, %v2068_v48  ;;  %v2030_v4 = vadd.f32 %v1979_v0, %v1778_v47  ;;  %v2055_v5 = vadd.f32 %v3976_v39, %v2032_v61 }
 0x252   :  { %v3005_v34 = vpop.f32.mrf.mxu1  ;;  %v2313_v63 = vmax.f32 %v2297_v40, 0.0  ;;  %v1802_v61 = vadd.f32 %v3939_v56, %v3949_v50  ;;  %v1794_v40 = vadd.f32 %v3941_v19, %v3953_v59 }
 0x253   :  { %v2316_v42 = vmax.f32 %v2300_v1, 0.0  ;;  %v2053_v36 = vadd.f32 %v3976_v39, %v2030_v4  ;;  %v2298_v37 = vadd.f32 %v2238_v6, %v2066_v55  ;;  %v2033_v45 = vadd.f32 %v3005_v34, %v1789_v28 }
 0x254   :  { %v2071_v2 = vmax.f32 %v2055_v5, 0.0  ;;  %v1982_v52 = vpop.f32.mrf.mxu1  ;;  %v1805_v1 = vadd.f32 %v3943_v49, %v3957_v43  ;;  %v1810_v43 = vadd.f32 %v3955_v44, %v3967_v58 }
 0x255   :  { %v2667_v20 = vpack.c.bf16 %v2316_v42, %v2315_v29  ;;  %v2314_v8 = vmax.f32 %v2298_v37, 0.0  ;;  %v2056_v17 = vadd.f32 %v3976_v39, %v2033_v45  ;;  %v2069_v54 = vmax.f32 %v2053_v36, 0.0 }
 0x256   :  { %v2031_v62 = vadd.f32 %v1982_v52, %v1781_v27  ;;  %v3008_v26 = vpop.f32.mrf.mxu1  ;;  %v2303_v3 = vadd.f32 %v2259_v11, %v2071_v2  ;;  %v1797_v29 = vadd.f32 %v3947_v14, %v3961_v25  ;;  %v1818_v42 = vadd.f32 %v3951_v46, %v3965_v10 }
 0x257   :  { %2703 = vst [vmem:[#allocation12 + $0x8] sm:$0xff] %v2667_v20   ;;  %v2662_v31 = vpack.c.bf16 %v2314_v8, %v2313_v63  ;;  %v2072_v32 = vmax.f32 %v2056_v17, 0.0  ;;  %v2301_v51 = vadd.f32 %v2251_v23, %v2069_v54  ;;  %v2036_v4 = vadd.f32 %v3008_v26, %v1802_v61 }
 0x258   :  { %v2054_v15 = vadd.f32 %v3976_v39, %v2031_v62  ;;  %v1995_v33 = vpop.f32.mrf.mxu1  ;;  %v2319_v21 = vmax.f32 %v2303_v3, 0.0  ;;  %v1821_v14 = vadd.f32 %v3959_v35, %v3969_v12  ;;  %v1813_v10 = vadd.f32 %v3963_v38, %v3971_v24 }
 0x259   :  { %2663 = vst [vmem:[#allocation12] sm:$0xff] %v2662_v31   ;;  %v2304_v57 = vadd.f32 %v2262_v41, %v2072_v32  ;;  %v2317_v9 = vmax.f32 %v2301_v51, 0.0  ;;  %v2034_v5 = vadd.f32 %v1995_v33, %v1794_v40  ;;  %v2059_v56 = vadd.f32 %v3976_v39, %v2036_v4 }
 0x25a   :  { %v2070_v30 = vmax.f32 %v2054_v15, 0.0  ;;  %v3009_v60 = vpop.f32.mrf.mxu1 }
 0x25b   :  { %v2320_v22 = vmax.f32 %v2304_v57, 0.0  ;;  %v2037_v34 = vadd.f32 %v3009_v60, %v1805_v1  ;;  %v2057_v19 = vadd.f32 %v3976_v39, %v2034_v5  ;;  %v2075_v45 = vmax.f32 %v2059_v56, 0.0 }
 0x25c   :  { %v2302_v47 = vadd.f32 %v2254_v7, %v2070_v30  ;;  %v1998_v48 = vpop.f32.mrf.mxu1 }
 0x25d   :  { %v2677_v16 = vpack.c.bf16 %v2320_v22, %v2319_v21  ;;  %v2035_v50 = vadd.f32 %v1998_v48, %v1797_v29  ;;  %v2060_v49 = vadd.f32 %v3976_v39, %v2037_v34  ;;  %v2073_v63 = vmax.f32 %v2057_v19, 0.0 }
 0x25e   :  { %v2318_v6 = vmax.f32 %v2302_v47, 0.0  ;;  %v3012_v28 = vpop.f32.mrf.mxu1 }
 0x25f   :  { %2705 = vst [vmem:[#allocation12 + $0x18] sm:$0xff] %v2677_v16   ;;  %v2040_v25 = vadd.f32 %v3012_v28, %v1818_v42  ;;  %v2058_v27 = vadd.f32 %v3976_v39, %v2035_v50  ;;  %v2076_v20 = vmax.f32 %v2060_v49, 0.0 }
 0x260   :  { %v2672_v0 = vpack.c.bf16 %v2318_v6, %v2317_v9  ;;  %v2011_v55 = vpop.f32.mrf.mxu1 }
 0x261   :  { %v2038_v2 = vadd.f32 %v2011_v55, %v1810_v43  ;;  %v2063_v35 = vadd.f32 %v3976_v39, %v2040_v25  ;;  %v2074_v17 = vmax.f32 %v2058_v27, 0.0 }
 0x262   :  { %2704 = vst [vmem:[#allocation12 + $0x10] sm:$0xff] %v2672_v0   ;;  %v3013_v13 = vpop.f32.mrf.mxu1 }
 0x263   :  { %v2041_v52 = vadd.f32 %v3013_v13, %v1821_v14  ;;  %v2061_v23 = vadd.f32 %v3976_v39, %v2038_v2  ;;  %v2079_v15 = vmax.f32 %v2063_v35, 0.0 }
 0x264   :  { %v2014_v11 = vpop.f32.mrf.mxu1 }
 0x265   :  { %v2039_v58 = vadd.f32 %v2014_v11, %v1813_v10  ;;  %v2064_v38 = vadd.f32 %v3976_v39, %v2041_v52  ;;  %v2077_v21 = vmax.f32 %v2061_v23, 0.0 }
 0x267   :  { %v3040_v36 = vpop.f32.mrf.mxu1  ;;  %v2062_v33 = vadd.f32 %v3976_v39, %v2039_v58  ;;  %v2080_v47 = vmax.f32 %v2064_v38, 0.0 }
 0x268   :  { %v2275_v59 = vadd.f32 %v3040_v36, %v3981_v53 }
 0x269   :  { %v2266_v37 = vpop.f32.mrf.mxu1  ;;  %v2078_v28 = vmax.f32 %v2062_v33, 0.0 }
 0x26a   :  { %v2267_v46 = vadd.f32 %v3981_v53, %v2266_v37  ;;  %v2307_v8 = vadd.f32 %v2275_v59, %v2075_v45 }
 0x26b   :  { %v3041_v41 = vpop.f32.mrf.mxu1 }
 0x26c   :  { %v2278_v44 = vadd.f32 %v3041_v41, %v3981_v53  ;;  %v2305_v18 = vadd.f32 %v2267_v46, %v2073_v63  ;;  %v2323_v26 = vmax.f32 %v2307_v8, 0.0 }
 0x26d   :  { %v2269_v12 = vpop.f32.mrf.mxu1 }
 0x26e   :  { %v2308_v54 = vadd.f32 %v2278_v44, %v2076_v20  ;;  %v2270_v62 = vadd.f32 %v3981_v53, %v2269_v12  ;;  %v2321_v57 = vmax.f32 %v2305_v18, 0.0 }
 0x26f   :  { %v3044_v24 = vpop.f32.mrf.mxu1 }
 0x270   :  { %v2324_v31 = vmax.f32 %v2308_v54, 0.0  ;;  %v2306_v32 = vadd.f32 %v2270_v62, %v2074_v17  ;;  %v2291_v3 = vadd.f32 %v3044_v24, %v3981_v53 }
 0x271   :  { %v2282_v7 = vpop.f32.mrf.mxu1 }
 0x272   :  { %v2687_v30 = vpack.c.bf16 %v2324_v31, %v2323_v26  ;;  %v2322_v51 = vmax.f32 %v2306_v32, 0.0  ;;  %v2283_v60 = vadd.f32 %v3981_v53, %v2282_v7  ;;  %v2311_v16 = vadd.f32 %v2291_v3, %v2079_v15 }
 0x273   :  { %v3045_v22 = vpop.f32.mrf.mxu1 }
 0x274   :  { %2707 = vst [vmem:[#allocation12 + $0x28] sm:$0xff] %v2687_v30   ;;  %v2682_v48 = vpack.c.bf16 %v2322_v51, %v2321_v57  ;;  %v2294_v9 = vadd.f32 %v3045_v22, %v3981_v53  ;;  %v2309_v61 = vadd.f32 %v2283_v60, %v2077_v21  ;;  %v2327_v55 = vmax.f32 %v2311_v16, 0.0 }
 0x275   :  { %v2285_v6 = vpop.f32.mrf.mxu1 }
 0x276   :  { %2706 = vst [vmem:[#allocation12 + $0x20] sm:$0xff] %v2682_v48   ;;  %v2312_v0 = vadd.f32 %v2294_v9, %v2080_v47  ;;  %v2286_v39 = vadd.f32 %v3981_v53, %v2285_v6  ;;  %v2325_v4 = vmax.f32 %v2309_v61, 0.0 }
 0x278   :  { %v2328_v40 = vmax.f32 %v2312_v0, 0.0  ;;  %v2310_v1 = vadd.f32 %v2286_v39, %v2078_v28 }
 0x27a   :  { %v2697_v13 = vpack.c.bf16 %v2328_v40, %v2327_v55  ;;  %v2326_v29 = vmax.f32 %v2310_v1, 0.0 }
 0x27c   :  { %2709 = vst [vmem:[#allocation12 + $0x38] sm:$0xff] %v2697_v13   ;;  %v2692_v5 = vpack.c.bf16 %v2326_v29, %v2325_v4 }
 0x27e   :  { %2708 = vst [vmem:[#allocation12 + $0x30] sm:$0xff] %v2692_v5  }
 0x27f   :  { %3240 = shalt.err (!%p3237_p10)
}
 0x280   :  { %2420 = dma.vmem_to_hbm [thread:$0]  %s2415_s6, 1024, %s4046_s7, [#allocation6], %s3259_s29, %s3259_s29, %s3260_s30  }
 0x281   :  { %3255 = dma.done.wait [#allocation6], 1024  }
 0x282   :  { %3256 = vsyncadd [#allocation6], 4294966272 }
 0x283   :  { %2424 = vsyncpa [#allocation5], 1 }
 0x284   :  { %2425 = vsyncpa [#allocation8], 1 }
 0x285   :  { %2426 = vsyncpa [#allocation11], 1 }
 0x286   :  { %2427 = vsyncpa [#allocation6], 1 }

</bundles_post_ra>
